<compile_context>
chip_gen: v7x
topology: tpu7x:2x2x1
jax: 0.10.0
libtpu: 0.0.40
codegen_flags: <defaults>
</compile_context>

<pallas_src>
import functools
import math

import jax
import jax.numpy as jnp
from jax.experimental import pallas as pl
from jax.experimental.pallas import tpu as pltpu


def _gnn_kernel(ain_ref, aout_ref, h_ref, wedge_ref, wgi_in_ref, wgi_out_ref,
                wgh_ref, bias_ref, o_ref, *, step):
    """Fused GNN forward for one block of `bb` batch rows, all `step` steps.

    ain_ref   : (bb, N, N)   A[:, :, :N]
    aout_ref  : (bb, N, N)   A[:, :, N:2N]
    h_ref     : (bb, N, H)   node hidden states
    wedge_ref : (2, H, H)    [W_edge_in^T, W_edge_out^T]
    wgi_in_ref: (3, H, H)    per-gate w_ih (input_in half, transposed)
    wgi_out_ref:(3, H, H)    per-gate w_ih (input_out half, transposed)
    wgh_ref   : (3, H, H)    per-gate w_hh (transposed)
    bias_ref  : (6, H)       pre-folded biases (see _pack_params)
    o_ref     : (bb, N, H)   updated hidden states
    """
    f32 = jnp.float32
    bb = h_ref.shape[0]

    # Grid-invariant parameter views (same block every grid step -> no re-DMA).
    w_ein, w_eout = wedge_ref[0], wedge_ref[1]
    b_ein = bias_ref[0:1, :]    # (1, H), broadcasts over nodes
    b_eout = bias_ref[1:2, :]
    b_r = bias_ref[2:3, :]      # combined w_ih + w_hh + propagation bias (reset)
    b_z = bias_ref[3:4, :]      # combined (update)
    b_in = bias_ref[4:5, :]     # new-gate input-path bias
    b_hn = bias_ref[5:6, :]     # new-gate hidden-path bias (scaled by resetgate)

    for b in range(bb):                          # static unroll over batch rows
        a_in = ain_ref[b]                        # (N, N)
        a_out = aout_ref[b]                      # (N, N)
        h = h_ref[b].astype(f32)                 # (N, H)

        for _ in range(step):                    # propagation steps stay on-chip
            # Edge-wise Linear transforms: h @ W^T + b
            ein = jnp.dot(h, w_ein, preferred_element_type=f32) + b_ein
            eout = jnp.dot(h, w_eout, preferred_element_type=f32) + b_eout

            # Graph propagation (b_iah / b_oah are folded into b_r/b_z/b_in).
            pin = jnp.dot(a_in, ein, preferred_element_type=f32)     # (N, H)
            pout = jnp.dot(a_out, eout, preferred_element_type=f32)  # (N, H)

            # gi = cat([input_in, input_out], -1) @ w_ih^T, computed per gate as
            # two H-wide matmuls so the 2H concat never materializes.
            i_r = (jnp.dot(pin, wgi_in_ref[0], preferred_element_type=f32)
                   + jnp.dot(pout, wgi_out_ref[0], preferred_element_type=f32))
            i_z = (jnp.dot(pin, wgi_in_ref[1], preferred_element_type=f32)
                   + jnp.dot(pout, wgi_out_ref[1], preferred_element_type=f32))
            i_n = (jnp.dot(pin, wgi_in_ref[2], preferred_element_type=f32)
                   + jnp.dot(pout, wgi_out_ref[2], preferred_element_type=f32))

            # gh = hidden @ w_hh^T, per gate.
            h_r = jnp.dot(h, wgh_ref[0], preferred_element_type=f32)
            h_z = jnp.dot(h, wgh_ref[1], preferred_element_type=f32)
            h_n = jnp.dot(h, wgh_ref[2], preferred_element_type=f32)

            resetgate = jax.nn.sigmoid(i_r + h_r + b_r)
            inputgate = jax.nn.sigmoid(i_z + h_z + b_z)
            newgate = jnp.tanh(i_n + b_in + resetgate * (h_n + b_hn))
            h = newgate + inputgate * (h - newgate)

        o_ref[b] = h.astype(o_ref.dtype)


def _pack_params(params, H):
    """Pre-transpose / pre-fold PyTorch-layout parameters for the kernel."""
    f32 = jnp.float32
    we_in = params["linear_edge_in_w"].astype(f32)      # (H, H), PyTorch (out,in)
    we_out = params["linear_edge_out_w"].astype(f32)
    wedge = jnp.stack([we_in.T, we_out.T], axis=0)      # (2, H, H)

    w_ih = params["w_ih"].astype(f32)                   # (3H, 2H)
    w_hh = params["w_hh"].astype(f32)                   # (3H, H)
    wgi_in = jnp.stack([w_ih[g * H:(g + 1) * H, :H].T for g in range(3)], 0)
    wgi_out = jnp.stack([w_ih[g * H:(g + 1) * H, H:].T for g in range(3)], 0)
    wgh = jnp.stack([w_hh[g * H:(g + 1) * H, :].T for g in range(3)], 0)

    b_ih = params["b_ih"].astype(f32)
    b_hh = params["b_hh"].astype(f32)
    b_iah = params["b_iah"].astype(f32)
    b_oah = params["b_oah"].astype(f32)

    # Fold the propagation biases through w_ih:
    #   gi[g] = pin @ Wgi_in[g] + pout @ Wgi_out[g]
    #           + (b_iah @ Wgi_in[g] + b_oah @ Wgi_out[g] + b_ih[g]).
    bias_gi = [b_iah @ wgi_in[g] + b_oah @ wgi_out[g] + b_ih[g * H:(g + 1) * H]
               for g in range(3)]
    bias_gh = [b_hh[g * H:(g + 1) * H] for g in range(3)]

    bias = jnp.stack([
        params["linear_edge_in_b"].astype(f32),
        params["linear_edge_out_b"].astype(f32),
        bias_gi[0] + bias_gh[0],     # reset gate: gi + gh biases merge
        bias_gi[1] + bias_gh[1],     # update gate
        bias_gi[2],                  # new gate, input path
        bias_gh[2],                  # new gate, hidden path (multiplied by r)
    ], axis=0)                       # (6, H)
    return wedge, wgi_in, wgi_out, wgh, bias


def _pick_batch_block(B, max_bb=8):
    """Largest divisor of B <= max_bb that still leaves >= 2 grid steps
    (so the batch axis remains shardable across megacore TensorCores)."""
    cands = [bb for bb in range(1, min(B, max_bb) + 1)
             if B % bb == 0 and B // bb >= 2]
    return max(cands) if cands else B


def gnn_forward(params, A, hidden, *, step=1, batch_block=None):
    """Mirror of GNN.forward: `step` GNNCell applications, fully fused."""
    B, N, H = hidden.shape
    assert A.shape == (B, N, 2 * N)
    bb = batch_block or _pick_batch_block(B)
    assert B % bb == 0

    wedge, wgi_in, wgi_out, wgh, bias = _pack_params(params, H)
    a_in = A[:, :, :N].astype(jnp.float32)
    a_out = A[:, :, N:2 * N].astype(jnp.float32)
    h0 = hidden.astype(jnp.float32)

    # Advisory cost estimate for XLA's scheduler around the custom call.
    flops = step * B * (22 * N * H * H + 4 * N * N * H)
    weight_bytes = 4 * (wedge.size + wgi_in.size + wgi_out.size + wgh.size + bias.size)
    bytes_accessed = 4 * (2 * B * N * N + 2 * B * N * H) + weight_bytes

    out = pl.pallas_call(
        functools.partial(_gnn_kernel, step=step),
        out_shape=jax.ShapeDtypeStruct((B, N, H), jnp.float32),
        grid_spec=pltpu.PrefetchScalarGridSpec(
            num_scalar_prefetch=0,
            grid=(B // bb,),
            in_specs=[
                pl.BlockSpec((bb, N, N), lambda i: (i, 0, 0)),      # A_in
                pl.BlockSpec((bb, N, N), lambda i: (i, 0, 0)),      # A_out
                pl.BlockSpec((bb, N, H), lambda i: (i, 0, 0)),      # hidden
                pl.BlockSpec((2, H, H), lambda i: (0, 0, 0)),       # edge weights
                pl.BlockSpec((3, H, H), lambda i: (0, 0, 0)),       # w_ih (in half)
                pl.BlockSpec((3, H, H), lambda i: (0, 0, 0)),       # w_ih (out half)
                pl.BlockSpec((3, H, H), lambda i: (0, 0, 0)),       # w_hh
                pl.BlockSpec((6, H), lambda i: (0, 0)),             # folded biases
            ],
            out_specs=pl.BlockSpec((bb, N, H), lambda i: (i, 0, 0)),
        ),
        compiler_params=pltpu.CompilerParams(
            dimension_semantics=("parallel",)),
        cost_estimate=pl.CostEstimate(
            flops=flops,
            transcendentals=step * 3 * B * N * H,
            bytes_accessed=bytes_accessed),
    )(a_in, a_out, h0, wedge, wgi_in, wgi_out, wgh, bias)
    return out


def init_gnn_params(key, hidden_size):
    """Deterministic init matching the PyTorch module's parameter shapes
    (PyTorch layout: Linear weights are (out, in))."""
    H = 2 * hidden_size                # module sets self.hidden_size = 2*hidden_size
    gate, inp = 3 * H, 2 * H
    stdv = 1.0 / math.sqrt(H)
    ks = jax.random.split(key, 12)
    u = lambda k, shape: jax.random.uniform(k, shape, jnp.float32, -stdv, stdv)
    return {
        "w_ih": u(ks[0], (gate, inp)),
        "w_hh": u(ks[1], (gate, H)),
        "b_ih": u(ks[2], (gate,)),
        "b_hh": u(ks[3], (gate,)),
        "b_iah": u(ks[4], (H,)),
        "b_oah": u(ks[5], (H,)),
        "linear_edge_in_w": u(ks[6], (H, H)),
        "linear_edge_in_b": u(ks[7], (H,)),
        "linear_edge_out_w": u(ks[8], (H, H)),
        "linear_edge_out_b": u(ks[9], (H,)),
        # linear_edge_f is declared in __init__ but never used in forward().
        "linear_edge_f_w": u(ks[10], (H, H)),
        "linear_edge_f_b": u(ks[11], (H,)),
    }


def gnn_forward_reference(params, A, hidden, *, step=1):
    """Pure-JAX reference of GNN.forward (for the sanity check)."""
    B, N, H = hidden.shape
    hp = jax.lax.Precision.HIGHEST

    def cell(h):
        ein = jnp.einsum("bnh,kh->bnk", h, params["linear_edge_in_w"],
                         precision=hp) + params["linear_edge_in_b"]
        eout = jnp.einsum("bnh,kh->bnk", h, params["linear_edge_out_w"],
                          precision=hp) + params["linear_edge_out_b"]
        input_in = jnp.einsum("bnm,bmh->bnh", A[:, :, :N], ein,
                              precision=hp) + params["b_iah"]
        input_out = jnp.einsum("bnm,bmh->bnh", A[:, :, N:2 * N], eout,
                               precision=hp) + params["b_oah"]
        inputs = jnp.concatenate([input_in, input_out], axis=2)
        gi = jnp.einsum("bni,gi->bng", inputs, params["w_ih"],
                        precision=hp) + params["b_ih"]
        gh = jnp.einsum("bnh,gh->bng", h, params["w_hh"],
                        precision=hp) + params["b_hh"]
        i_r, i_i, i_n = jnp.split(gi, 3, axis=2)
        h_r, h_i, h_n = jnp.split(gh, 3, axis=2)
        resetgate = jax.nn.sigmoid(i_r + h_r)
        inputgate = jax.nn.sigmoid(i_i + h_i)
        newgate = jnp.tanh(i_n + resetgate * h_n)
        return newgate + inputgate * (h - newgate)

    for _ in range(step):
        hidden = cell(hidden)
    return hidden


if __name__ == "__main__":
    key = jax.random.PRNGKey(0)
    k_p, k_a, k_h = jax.random.split(key, 3)

    hidden_size = 16            # module doubles it internally -> H = 32
    H = 2 * hidden_size
    batch = 4
    n_nodes = 8
    step = 2                    # exercises the in-kernel propagation loop

    params = init_gnn_params(k_p, hidden_size)

    A = jax.random.uniform(k_a, (batch, n_nodes, 2 * n_nodes), jnp.float32)
    hidden = jax.random.normal(k_h, (batch, n_nodes, H), jnp.float32)

    out = gnn_forward(params, A, hidden, step=step)
    jax.block_until_ready(out)

    ref = gnn_forward_reference(params, A, hidden, step=step)
    assert out.shape == (batch, n_nodes, H)
    assert jnp.allclose(out, ref, atol=1e-2, rtol=1e-2), (
        float(jnp.max(jnp.abs(out - ref))))

    print("KERNEL_OK")
</pallas_src>

<mosaic_0001>
module attributes {stable_mosaic.version = 11 : i64} {
  func.func @_gnn_kernel(%arg0: i32, %arg1: memref<2x8x8xf32, #tpu.memory_space<vmem>>, %arg2: memref<2x8x8xf32, #tpu.memory_space<vmem>>, %arg3: memref<2x8x32xf32, #tpu.memory_space<vmem>>, %arg4: memref<2x32x32xf32, #tpu.memory_space<vmem>>, %arg5: memref<3x32x32xf32, #tpu.memory_space<vmem>>, %arg6: memref<3x32x32xf32, #tpu.memory_space<vmem>>, %arg7: memref<3x32x32xf32, #tpu.memory_space<vmem>>, %arg8: memref<6x32xf32, #tpu.memory_space<vmem>>, %arg9: memref<2x8x32xf32, #tpu.memory_space<vmem>>) attributes {dimension_semantics = [#tpu.dimension_semantics<parallel>], iteration_bounds = array<i64: 2>, scalar_prefetch = 0 : i64, scratch_operands = 0 : i64, tpu.core_type = #tpu.core_type<tc>, window_params = [{transform_indices = @transform_0, window_bounds = array<i64: 2, 8, 8>}, {transform_indices = @transform_1, window_bounds = array<i64: 2, 8, 8>}, {transform_indices = @transform_2, window_bounds = array<i64: 2, 8, 32>}, {pipeline_mode = #tpu.pipeline_mode<synchronous>, transform_indices = @transform_3, window_bounds = array<i64: 2, 32, 32>}, {pipeline_mode = #tpu.pipeline_mode<synchronous>, transform_indices = @transform_4, window_bounds = array<i64: 3, 32, 32>}, {pipeline_mode = #tpu.pipeline_mode<synchronous>, transform_indices = @transform_5, window_bounds = array<i64: 3, 32, 32>}, {pipeline_mode = #tpu.pipeline_mode<synchronous>, transform_indices = @transform_6, window_bounds = array<i64: 3, 32, 32>}, {pipeline_mode = #tpu.pipeline_mode<synchronous>, transform_indices = @transform_7, window_bounds = array<i64: 6, 32>}, {transform_indices = @transform_8, window_bounds = array<i64: 2, 8, 32>}]} {
    %c0 = arith.constant 0 : index
    %c0_0 = arith.constant 0 : index
    %c0_1 = arith.constant 0 : index
    %0 = vector.load %arg4[%c0, %c0_0, %c0_1] : memref<2x32x32xf32, #tpu.memory_space<vmem>>, vector<1x32x32xf32>
    %1 = vector.shape_cast %0 : vector<1x32x32xf32> to vector<32x32xf32>
    %c1 = arith.constant 1 : index
    %c0_2 = arith.constant 0 : index
    %c0_3 = arith.constant 0 : index
    %2 = vector.load %arg4[%c1, %c0_2, %c0_3] : memref<2x32x32xf32, #tpu.memory_space<vmem>>, vector<1x32x32xf32>
    %3 = vector.shape_cast %2 : vector<1x32x32xf32> to vector<32x32xf32>
    %c0_4 = arith.constant 0 : index
    %c0_5 = arith.constant 0 : index
    %4 = vector.load %arg8[%c0_4, %c0_5] : memref<6x32xf32, #tpu.memory_space<vmem>>, vector<1x32xf32>
    %c1_6 = arith.constant 1 : index
    %c0_7 = arith.constant 0 : index
    %5 = vector.load %arg8[%c1_6, %c0_7] : memref<6x32xf32, #tpu.memory_space<vmem>>, vector<1x32xf32>
    %c2 = arith.constant 2 : index
    %c0_8 = arith.constant 0 : index
    %6 = vector.load %arg8[%c2, %c0_8] : memref<6x32xf32, #tpu.memory_space<vmem>>, vector<1x32xf32>
    %c3 = arith.constant 3 : index
    %c0_9 = arith.constant 0 : index
    %7 = vector.load %arg8[%c3, %c0_9] : memref<6x32xf32, #tpu.memory_space<vmem>>, vector<1x32xf32>
    %c4 = arith.constant 4 : index
    %c0_10 = arith.constant 0 : index
    %8 = vector.load %arg8[%c4, %c0_10] : memref<6x32xf32, #tpu.memory_space<vmem>>, vector<1x32xf32>
    %c5 = arith.constant 5 : index
    %c0_11 = arith.constant 0 : index
    %9 = vector.load %arg8[%c5, %c0_11] : memref<6x32xf32, #tpu.memory_space<vmem>>, vector<1x32xf32>
    %c0_12 = arith.constant 0 : index
    %c0_13 = arith.constant 0 : index
    %c0_14 = arith.constant 0 : index
    %10 = vector.load %arg1[%c0_12, %c0_13, %c0_14] : memref<2x8x8xf32, #tpu.memory_space<vmem>>, vector<1x8x8xf32>
    %11 = vector.shape_cast %10 : vector<1x8x8xf32> to vector<8x8xf32>
    %c0_15 = arith.constant 0 : index
    %c0_16 = arith.constant 0 : index
    %c0_17 = arith.constant 0 : index
    %12 = vector.load %arg2[%c0_15, %c0_16, %c0_17] : memref<2x8x8xf32, #tpu.memory_space<vmem>>, vector<1x8x8xf32>
    %13 = vector.shape_cast %12 : vector<1x8x8xf32> to vector<8x8xf32>
    %c0_18 = arith.constant 0 : index
    %c0_19 = arith.constant 0 : index
    %c0_20 = arith.constant 0 : index
    %14 = vector.load %arg3[%c0_18, %c0_19, %c0_20] : memref<2x8x32xf32, #tpu.memory_space<vmem>>, vector<1x8x32xf32>
    %15 = vector.shape_cast %14 : vector<1x8x32xf32> to vector<8x32xf32>
    %cst = arith.constant dense<0.000000e+00> : vector<8x32xf32>
    %16 = tpu.matmul %15, %1, %cst {dimension_numbers = #tpu.dot_dimension_numbers<[1], [0], [0], [1], [0, 0, 1, 1], [], []>} : vector<8x32xf32>, vector<32x32xf32>, vector<8x32xf32> -> vector<8x32xf32>
    %17 = vector.broadcast %4 : vector<1x32xf32> to vector<8x32xf32>
    %18 = arith.addf %16, %17 : vector<8x32xf32>
    %cst_21 = arith.constant dense<0.000000e+00> : vector<8x32xf32>
    %19 = tpu.matmul %15, %3, %cst_21 {dimension_numbers = #tpu.dot_dimension_numbers<[1], [0], [0], [1], [0, 0, 1, 1], [], []>} : vector<8x32xf32>, vector<32x32xf32>, vector<8x32xf32> -> vector<8x32xf32>
    %20 = vector.broadcast %5 : vector<1x32xf32> to vector<8x32xf32>
    %21 = arith.addf %19, %20 : vector<8x32xf32>
    %cst_22 = arith.constant dense<0.000000e+00> : vector<8x32xf32>
    %22 = tpu.matmul %11, %18, %cst_22 {dimension_numbers = #tpu.dot_dimension_numbers<[1], [0], [0], [1], [0, 0, 1, 1], [], []>} : vector<8x8xf32>, vector<8x32xf32>, vector<8x32xf32> -> vector<8x32xf32>
    %cst_23 = arith.constant dense<0.000000e+00> : vector<8x32xf32>
    %23 = tpu.matmul %13, %21, %cst_23 {dimension_numbers = #tpu.dot_dimension_numbers<[1], [0], [0], [1], [0, 0, 1, 1], [], []>} : vector<8x8xf32>, vector<8x32xf32>, vector<8x32xf32> -> vector<8x32xf32>
    %c0_24 = arith.constant 0 : index
    %c0_25 = arith.constant 0 : index
    %c0_26 = arith.constant 0 : index
    %24 = vector.load %arg5[%c0_24, %c0_25, %c0_26] : memref<3x32x32xf32, #tpu.memory_space<vmem>>, vector<1x32x32xf32>
    %25 = vector.shape_cast %24 : vector<1x32x32xf32> to vector<32x32xf32>
    %cst_27 = arith.constant dense<0.000000e+00> : vector<8x32xf32>
    %26 = tpu.matmul %22, %25, %cst_27 {dimension_numbers = #tpu.dot_dimension_numbers<[1], [0], [0], [1], [0, 0, 1, 1], [], []>} : vector<8x32xf32>, vector<32x32xf32>, vector<8x32xf32> -> vector<8x32xf32>
    %c0_28 = arith.constant 0 : index
    %c0_29 = arith.constant 0 : index
    %c0_30 = arith.constant 0 : index
    %27 = vector.load %arg6[%c0_28, %c0_29, %c0_30] : memref<3x32x32xf32, #tpu.memory_space<vmem>>, vector<1x32x32xf32>
    %28 = vector.shape_cast %27 : vector<1x32x32xf32> to vector<32x32xf32>
    %cst_31 = arith.constant dense<0.000000e+00> : vector<8x32xf32>
    %29 = tpu.matmul %23, %28, %cst_31 {dimension_numbers = #tpu.dot_dimension_numbers<[1], [0], [0], [1], [0, 0, 1, 1], [], []>} : vector<8x32xf32>, vector<32x32xf32>, vector<8x32xf32> -> vector<8x32xf32>
    %30 = arith.addf %26, %29 : vector<8x32xf32>
    %c1_32 = arith.constant 1 : index
    %c0_33 = arith.constant 0 : index
    %c0_34 = arith.constant 0 : index
    %31 = vector.load %arg5[%c1_32, %c0_33, %c0_34] : memref<3x32x32xf32, #tpu.memory_space<vmem>>, vector<1x32x32xf32>
    %32 = vector.shape_cast %31 : vector<1x32x32xf32> to vector<32x32xf32>
    %cst_35 = arith.constant dense<0.000000e+00> : vector<8x32xf32>
    %33 = tpu.matmul %22, %32, %cst_35 {dimension_numbers = #tpu.dot_dimension_numbers<[1], [0], [0], [1], [0, 0, 1, 1], [], []>} : vector<8x32xf32>, vector<32x32xf32>, vector<8x32xf32> -> vector<8x32xf32>
    %c1_36 = arith.constant 1 : index
    %c0_37 = arith.constant 0 : index
    %c0_38 = arith.constant 0 : index
    %34 = vector.load %arg6[%c1_36, %c0_37, %c0_38] : memref<3x32x32xf32, #tpu.memory_space<vmem>>, vector<1x32x32xf32>
    %35 = vector.shape_cast %34 : vector<1x32x32xf32> to vector<32x32xf32>
    %cst_39 = arith.constant dense<0.000000e+00> : vector<8x32xf32>
    %36 = tpu.matmul %23, %35, %cst_39 {dimension_numbers = #tpu.dot_dimension_numbers<[1], [0], [0], [1], [0, 0, 1, 1], [], []>} : vector<8x32xf32>, vector<32x32xf32>, vector<8x32xf32> -> vector<8x32xf32>
    %37 = arith.addf %33, %36 : vector<8x32xf32>
    %c2_40 = arith.constant 2 : index
    %c0_41 = arith.constant 0 : index
    %c0_42 = arith.constant 0 : index
    %38 = vector.load %arg5[%c2_40, %c0_41, %c0_42] : memref<3x32x32xf32, #tpu.memory_space<vmem>>, vector<1x32x32xf32>
    %39 = vector.shape_cast %38 : vector<1x32x32xf32> to vector<32x32xf32>
    %cst_43 = arith.constant dense<0.000000e+00> : vector<8x32xf32>
    %40 = tpu.matmul %22, %39, %cst_43 {dimension_numbers = #tpu.dot_dimension_numbers<[1], [0], [0], [1], [0, 0, 1, 1], [], []>} : vector<8x32xf32>, vector<32x32xf32>, vector<8x32xf32> -> vector<8x32xf32>
    %c2_44 = arith.constant 2 : index
    %c0_45 = arith.constant 0 : index
    %c0_46 = arith.constant 0 : index
    %41 = vector.load %arg6[%c2_44, %c0_45, %c0_46] : memref<3x32x32xf32, #tpu.memory_space<vmem>>, vector<1x32x32xf32>
    %42 = vector.shape_cast %41 : vector<1x32x32xf32> to vector<32x32xf32>
    %cst_47 = arith.constant dense<0.000000e+00> : vector<8x32xf32>
    %43 = tpu.matmul %23, %42, %cst_47 {dimension_numbers = #tpu.dot_dimension_numbers<[1], [0], [0], [1], [0, 0, 1, 1], [], []>} : vector<8x32xf32>, vector<32x32xf32>, vector<8x32xf32> -> vector<8x32xf32>
    %44 = arith.addf %40, %43 : vector<8x32xf32>
    %c0_48 = arith.constant 0 : index
    %c0_49 = arith.constant 0 : index
    %c0_50 = arith.constant 0 : index
    %45 = vector.load %arg7[%c0_48, %c0_49, %c0_50] : memref<3x32x32xf32, #tpu.memory_space<vmem>>, vector<1x32x32xf32>
    %46 = vector.shape_cast %45 : vector<1x32x32xf32> to vector<32x32xf32>
    %cst_51 = arith.constant dense<0.000000e+00> : vector<8x32xf32>
    %47 = tpu.matmul %15, %46, %cst_51 {dimension_numbers = #tpu.dot_dimension_numbers<[1], [0], [0], [1], [0, 0, 1, 1], [], []>} : vector<8x32xf32>, vector<32x32xf32>, vector<8x32xf32> -> vector<8x32xf32>
    %c1_52 = arith.constant 1 : index
    %c0_53 = arith.constant 0 : index
    %c0_54 = arith.constant 0 : index
    %48 = vector.load %arg7[%c1_52, %c0_53, %c0_54] : memref<3x32x32xf32, #tpu.memory_space<vmem>>, vector<1x32x32xf32>
    %49 = vector.shape_cast %48 : vector<1x32x32xf32> to vector<32x32xf32>
    %cst_55 = arith.constant dense<0.000000e+00> : vector<8x32xf32>
    %50 = tpu.matmul %15, %49, %cst_55 {dimension_numbers = #tpu.dot_dimension_numbers<[1], [0], [0], [1], [0, 0, 1, 1], [], []>} : vector<8x32xf32>, vector<32x32xf32>, vector<8x32xf32> -> vector<8x32xf32>
    %c2_56 = arith.constant 2 : index
    %c0_57 = arith.constant 0 : index
    %c0_58 = arith.constant 0 : index
    %51 = vector.load %arg7[%c2_56, %c0_57, %c0_58] : memref<3x32x32xf32, #tpu.memory_space<vmem>>, vector<1x32x32xf32>
    %52 = vector.shape_cast %51 : vector<1x32x32xf32> to vector<32x32xf32>
    %cst_59 = arith.constant dense<0.000000e+00> : vector<8x32xf32>
    %53 = tpu.matmul %15, %52, %cst_59 {dimension_numbers = #tpu.dot_dimension_numbers<[1], [0], [0], [1], [0, 0, 1, 1], [], []>} : vector<8x32xf32>, vector<32x32xf32>, vector<8x32xf32> -> vector<8x32xf32>
    %54 = arith.addf %30, %47 : vector<8x32xf32>
    %55 = vector.broadcast %6 : vector<1x32xf32> to vector<8x32xf32>
    %56 = arith.addf %54, %55 : vector<8x32xf32>
    %57 = arith.negf %56 : vector<8x32xf32>
    %58 = math.exp %57 : vector<8x32xf32>
    %cst_60 = arith.constant 1.000000e+00 : f32
    %59 = vector.broadcast %cst_60 : f32 to vector<8x32xf32>
    %60 = arith.addf %59, %58 : vector<8x32xf32>
    %61 = arith.divf %59, %60 : vector<8x32xf32>
    %62 = arith.addf %37, %50 : vector<8x32xf32>
    %63 = vector.broadcast %7 : vector<1x32xf32> to vector<8x32xf32>
    %64 = arith.addf %62, %63 : vector<8x32xf32>
    %65 = arith.negf %64 : vector<8x32xf32>
    %66 = math.exp %65 : vector<8x32xf32>
    %cst_61 = arith.constant 1.000000e+00 : f32
    %67 = vector.broadcast %cst_61 : f32 to vector<8x32xf32>
    %68 = arith.addf %67, %66 : vector<8x32xf32>
    %69 = arith.divf %67, %68 : vector<8x32xf32>
    %70 = vector.broadcast %8 : vector<1x32xf32> to vector<8x32xf32>
    %71 = arith.addf %44, %70 : vector<8x32xf32>
    %72 = vector.broadcast %9 : vector<1x32xf32> to vector<8x32xf32>
    %73 = arith.addf %53, %72 : vector<8x32xf32>
    %74 = arith.mulf %61, %73 : vector<8x32xf32>
    %75 = arith.addf %71, %74 : vector<8x32xf32>
    %76 = math.tanh %75 : vector<8x32xf32>
    %77 = arith.subf %15, %76 : vector<8x32xf32>
    %78 = arith.mulf %69, %77 : vector<8x32xf32>
    %79 = arith.addf %76, %78 : vector<8x32xf32>
    %cst_62 = arith.constant dense<0.000000e+00> : vector<8x32xf32>
    %80 = tpu.matmul %79, %1, %cst_62 {dimension_numbers = #tpu.dot_dimension_numbers<[1], [0], [0], [1], [0, 0, 1, 1], [], []>} : vector<8x32xf32>, vector<32x32xf32>, vector<8x32xf32> -> vector<8x32xf32>
    %81 = vector.broadcast %4 : vector<1x32xf32> to vector<8x32xf32>
    %82 = arith.addf %80, %81 : vector<8x32xf32>
    %cst_63 = arith.constant dense<0.000000e+00> : vector<8x32xf32>
    %83 = tpu.matmul %79, %3, %cst_63 {dimension_numbers = #tpu.dot_dimension_numbers<[1], [0], [0], [1], [0, 0, 1, 1], [], []>} : vector<8x32xf32>, vector<32x32xf32>, vector<8x32xf32> -> vector<8x32xf32>
    %84 = vector.broadcast %5 : vector<1x32xf32> to vector<8x32xf32>
    %85 = arith.addf %83, %84 : vector<8x32xf32>
    %cst_64 = arith.constant dense<0.000000e+00> : vector<8x32xf32>
    %86 = tpu.matmul %11, %82, %cst_64 {dimension_numbers = #tpu.dot_dimension_numbers<[1], [0], [0], [1], [0, 0, 1, 1], [], []>} : vector<8x8xf32>, vector<8x32xf32>, vector<8x32xf32> -> vector<8x32xf32>
    %cst_65 = arith.constant dense<0.000000e+00> : vector<8x32xf32>
    %87 = tpu.matmul %13, %85, %cst_65 {dimension_numbers = #tpu.dot_dimension_numbers<[1], [0], [0], [1], [0, 0, 1, 1], [], []>} : vector<8x8xf32>, vector<8x32xf32>, vector<8x32xf32> -> vector<8x32xf32>
    %c0_66 = arith.constant 0 : index
    %c0_67 = arith.constant 0 : index
    %c0_68 = arith.constant 0 : index
    %88 = vector.load %arg5[%c0_66, %c0_67, %c0_68] : memref<3x32x32xf32, #tpu.memory_space<vmem>>, vector<1x32x32xf32>
    %89 = vector.shape_cast %88 : vector<1x32x32xf32> to vector<32x32xf32>
    %cst_69 = arith.constant dense<0.000000e+00> : vector<8x32xf32>
    %90 = tpu.matmul %86, %89, %cst_69 {dimension_numbers = #tpu.dot_dimension_numbers<[1], [0], [0], [1], [0, 0, 1, 1], [], []>} : vector<8x32xf32>, vector<32x32xf32>, vector<8x32xf32> -> vector<8x32xf32>
    %c0_70 = arith.constant 0 : index
    %c0_71 = arith.constant 0 : index
    %c0_72 = arith.constant 0 : index
    %91 = vector.load %arg6[%c0_70, %c0_71, %c0_72] : memref<3x32x32xf32, #tpu.memory_space<vmem>>, vector<1x32x32xf32>
    %92 = vector.shape_cast %91 : vector<1x32x32xf32> to vector<32x32xf32>
    %cst_73 = arith.constant dense<0.000000e+00> : vector<8x32xf32>
    %93 = tpu.matmul %87, %92, %cst_73 {dimension_numbers = #tpu.dot_dimension_numbers<[1], [0], [0], [1], [0, 0, 1, 1], [], []>} : vector<8x32xf32>, vector<32x32xf32>, vector<8x32xf32> -> vector<8x32xf32>
    %94 = arith.addf %90, %93 : vector<8x32xf32>
    %c1_74 = arith.constant 1 : index
    %c0_75 = arith.constant 0 : index
    %c0_76 = arith.constant 0 : index
    %95 = vector.load %arg5[%c1_74, %c0_75, %c0_76] : memref<3x32x32xf32, #tpu.memory_space<vmem>>, vector<1x32x32xf32>
    %96 = vector.shape_cast %95 : vector<1x32x32xf32> to vector<32x32xf32>
    %cst_77 = arith.constant dense<0.000000e+00> : vector<8x32xf32>
    %97 = tpu.matmul %86, %96, %cst_77 {dimension_numbers = #tpu.dot_dimension_numbers<[1], [0], [0], [1], [0, 0, 1, 1], [], []>} : vector<8x32xf32>, vector<32x32xf32>, vector<8x32xf32> -> vector<8x32xf32>
    %c1_78 = arith.constant 1 : index
    %c0_79 = arith.constant 0 : index
    %c0_80 = arith.constant 0 : index
    %98 = vector.load %arg6[%c1_78, %c0_79, %c0_80] : memref<3x32x32xf32, #tpu.memory_space<vmem>>, vector<1x32x32xf32>
    %99 = vector.shape_cast %98 : vector<1x32x32xf32> to vector<32x32xf32>
    %cst_81 = arith.constant dense<0.000000e+00> : vector<8x32xf32>
    %100 = tpu.matmul %87, %99, %cst_81 {dimension_numbers = #tpu.dot_dimension_numbers<[1], [0], [0], [1], [0, 0, 1, 1], [], []>} : vector<8x32xf32>, vector<32x32xf32>, vector<8x32xf32> -> vector<8x32xf32>
    %101 = arith.addf %97, %100 : vector<8x32xf32>
    %c2_82 = arith.constant 2 : index
    %c0_83 = arith.constant 0 : index
    %c0_84 = arith.constant 0 : index
    %102 = vector.load %arg5[%c2_82, %c0_83, %c0_84] : memref<3x32x32xf32, #tpu.memory_space<vmem>>, vector<1x32x32xf32>
    %103 = vector.shape_cast %102 : vector<1x32x32xf32> to vector<32x32xf32>
    %cst_85 = arith.constant dense<0.000000e+00> : vector<8x32xf32>
    %104 = tpu.matmul %86, %103, %cst_85 {dimension_numbers = #tpu.dot_dimension_numbers<[1], [0], [0], [1], [0, 0, 1, 1], [], []>} : vector<8x32xf32>, vector<32x32xf32>, vector<8x32xf32> -> vector<8x32xf32>
    %c2_86 = arith.constant 2 : index
    %c0_87 = arith.constant 0 : index
    %c0_88 = arith.constant 0 : index
    %105 = vector.load %arg6[%c2_86, %c0_87, %c0_88] : memref<3x32x32xf32, #tpu.memory_space<vmem>>, vector<1x32x32xf32>
    %106 = vector.shape_cast %105 : vector<1x32x32xf32> to vector<32x32xf32>
    %cst_89 = arith.constant dense<0.000000e+00> : vector<8x32xf32>
    %107 = tpu.matmul %87, %106, %cst_89 {dimension_numbers = #tpu.dot_dimension_numbers<[1], [0], [0], [1], [0, 0, 1, 1], [], []>} : vector<8x32xf32>, vector<32x32xf32>, vector<8x32xf32> -> vector<8x32xf32>
    %108 = arith.addf %104, %107 : vector<8x32xf32>
    %c0_90 = arith.constant 0 : index
    %c0_91 = arith.constant 0 : index
    %c0_92 = arith.constant 0 : index
    %109 = vector.load %arg7[%c0_90, %c0_91, %c0_92] : memref<3x32x32xf32, #tpu.memory_space<vmem>>, vector<1x32x32xf32>
    %110 = vector.shape_cast %109 : vector<1x32x32xf32> to vector<32x32xf32>
    %cst_93 = arith.constant dense<0.000000e+00> : vector<8x32xf32>
    %111 = tpu.matmul %79, %110, %cst_93 {dimension_numbers = #tpu.dot_dimension_numbers<[1], [0], [0], [1], [0, 0, 1, 1], [], []>} : vector<8x32xf32>, vector<32x32xf32>, vector<8x32xf32> -> vector<8x32xf32>
    %c1_94 = arith.constant 1 : index
    %c0_95 = arith.constant 0 : index
    %c0_96 = arith.constant 0 : index
    %112 = vector.load %arg7[%c1_94, %c0_95, %c0_96] : memref<3x32x32xf32, #tpu.memory_space<vmem>>, vector<1x32x32xf32>
    %113 = vector.shape_cast %112 : vector<1x32x32xf32> to vector<32x32xf32>
    %cst_97 = arith.constant dense<0.000000e+00> : vector<8x32xf32>
    %114 = tpu.matmul %79, %113, %cst_97 {dimension_numbers = #tpu.dot_dimension_numbers<[1], [0], [0], [1], [0, 0, 1, 1], [], []>} : vector<8x32xf32>, vector<32x32xf32>, vector<8x32xf32> -> vector<8x32xf32>
    %c2_98 = arith.constant 2 : index
    %c0_99 = arith.constant 0 : index
    %c0_100 = arith.constant 0 : index
    %115 = vector.load %arg7[%c2_98, %c0_99, %c0_100] : memref<3x32x32xf32, #tpu.memory_space<vmem>>, vector<1x32x32xf32>
    %116 = vector.shape_cast %115 : vector<1x32x32xf32> to vector<32x32xf32>
    %cst_101 = arith.constant dense<0.000000e+00> : vector<8x32xf32>
    %117 = tpu.matmul %79, %116, %cst_101 {dimension_numbers = #tpu.dot_dimension_numbers<[1], [0], [0], [1], [0, 0, 1, 1], [], []>} : vector<8x32xf32>, vector<32x32xf32>, vector<8x32xf32> -> vector<8x32xf32>
    %118 = arith.addf %94, %111 : vector<8x32xf32>
    %119 = vector.broadcast %6 : vector<1x32xf32> to vector<8x32xf32>
    %120 = arith.addf %118, %119 : vector<8x32xf32>
    %121 = arith.negf %120 : vector<8x32xf32>
    %122 = math.exp %121 : vector<8x32xf32>
    %cst_102 = arith.constant 1.000000e+00 : f32
    %123 = vector.broadcast %cst_102 : f32 to vector<8x32xf32>
    %124 = arith.addf %123, %122 : vector<8x32xf32>
    %125 = arith.divf %123, %124 : vector<8x32xf32>
    %126 = arith.addf %101, %114 : vector<8x32xf32>
    %127 = vector.broadcast %7 : vector<1x32xf32> to vector<8x32xf32>
    %128 = arith.addf %126, %127 : vector<8x32xf32>
    %129 = arith.negf %128 : vector<8x32xf32>
    %130 = math.exp %129 : vector<8x32xf32>
    %cst_103 = arith.constant 1.000000e+00 : f32
    %131 = vector.broadcast %cst_103 : f32 to vector<8x32xf32>
    %132 = arith.addf %131, %130 : vector<8x32xf32>
    %133 = arith.divf %131, %132 : vector<8x32xf32>
    %134 = vector.broadcast %8 : vector<1x32xf32> to vector<8x32xf32>
    %135 = arith.addf %108, %134 : vector<8x32xf32>
    %136 = vector.broadcast %9 : vector<1x32xf32> to vector<8x32xf32>
    %137 = arith.addf %117, %136 : vector<8x32xf32>
    %138 = arith.mulf %125, %137 : vector<8x32xf32>
    %139 = arith.addf %135, %138 : vector<8x32xf32>
    %140 = math.tanh %139 : vector<8x32xf32>
    %141 = arith.subf %79, %140 : vector<8x32xf32>
    %142 = arith.mulf %133, %141 : vector<8x32xf32>
    %143 = arith.addf %140, %142 : vector<8x32xf32>
    %c0_104 = arith.constant 0 : index
    %c0_105 = arith.constant 0 : index
    %c0_106 = arith.constant 0 : index
    %144 = vector.load %arg9[%c0_104, %c0_105, %c0_106] : memref<2x8x32xf32, #tpu.memory_space<vmem>>, vector<1x8x32xf32>
    %145 = vector.shape_cast %144 : vector<1x8x32xf32> to vector<8x32xf32>
    %146 = vector.shape_cast %143 : vector<8x32xf32> to vector<1x8x32xf32>
    tpu.vector_store %arg9[%c0_104, %c0_105, %c0_106], %146 {strides = array<i32>} : memref<2x8x32xf32, #tpu.memory_space<vmem>>, vector<1x8x32xf32>,
    %c1_107 = arith.constant 1 : index
    %c0_108 = arith.constant 0 : index
    %c0_109 = arith.constant 0 : index
    %147 = vector.load %arg1[%c1_107, %c0_108, %c0_109] : memref<2x8x8xf32, #tpu.memory_space<vmem>>, vector<1x8x8xf32>
    %148 = vector.shape_cast %147 : vector<1x8x8xf32> to vector<8x8xf32>
    %c1_110 = arith.constant 1 : index
    %c0_111 = arith.constant 0 : index
    %c0_112 = arith.constant 0 : index
    %149 = vector.load %arg2[%c1_110, %c0_111, %c0_112] : memref<2x8x8xf32, #tpu.memory_space<vmem>>, vector<1x8x8xf32>
    %150 = vector.shape_cast %149 : vector<1x8x8xf32> to vector<8x8xf32>
    %c1_113 = arith.constant 1 : index
    %c0_114 = arith.constant 0 : index
    %c0_115 = arith.constant 0 : index
    %151 = vector.load %arg3[%c1_113, %c0_114, %c0_115] : memref<2x8x32xf32, #tpu.memory_space<vmem>>, vector<1x8x32xf32>
    %152 = vector.shape_cast %151 : vector<1x8x32xf32> to vector<8x32xf32>
    %cst_116 = arith.constant dense<0.000000e+00> : vector<8x32xf32>
    %153 = tpu.matmul %152, %1, %cst_116 {dimension_numbers = #tpu.dot_dimension_numbers<[1], [0], [0], [1], [0, 0, 1, 1], [], []>} : vector<8x32xf32>, vector<32x32xf32>, vector<8x32xf32> -> vector<8x32xf32>
    %154 = vector.broadcast %4 : vector<1x32xf32> to vector<8x32xf32>
    %155 = arith.addf %153, %154 : vector<8x32xf32>
    %cst_117 = arith.constant dense<0.000000e+00> : vector<8x32xf32>
    %156 = tpu.matmul %152, %3, %cst_117 {dimension_numbers = #tpu.dot_dimension_numbers<[1], [0], [0], [1], [0, 0, 1, 1], [], []>} : vector<8x32xf32>, vector<32x32xf32>, vector<8x32xf32> -> vector<8x32xf32>
    %157 = vector.broadcast %5 : vector<1x32xf32> to vector<8x32xf32>
    %158 = arith.addf %156, %157 : vector<8x32xf32>
    %cst_118 = arith.constant dense<0.000000e+00> : vector<8x32xf32>
    %159 = tpu.matmul %148, %155, %cst_118 {dimension_numbers = #tpu.dot_dimension_numbers<[1], [0], [0], [1], [0, 0, 1, 1], [], []>} : vector<8x8xf32>, vector<8x32xf32>, vector<8x32xf32> -> vector<8x32xf32>
    %cst_119 = arith.constant dense<0.000000e+00> : vector<8x32xf32>
    %160 = tpu.matmul %150, %158, %cst_119 {dimension_numbers = #tpu.dot_dimension_numbers<[1], [0], [0], [1], [0, 0, 1, 1], [], []>} : vector<8x8xf32>, vector<8x32xf32>, vector<8x32xf32> -> vector<8x32xf32>
    %c0_120 = arith.constant 0 : index
    %c0_121 = arith.constant 0 : index
    %c0_122 = arith.constant 0 : index
    %161 = vector.load %arg5[%c0_120, %c0_121, %c0_122] : memref<3x32x32xf32, #tpu.memory_space<vmem>>, vector<1x32x32xf32>
    %162 = vector.shape_cast %161 : vector<1x32x32xf32> to vector<32x32xf32>
    %cst_123 = arith.constant dense<0.000000e+00> : vector<8x32xf32>
    %163 = tpu.matmul %159, %162, %cst_123 {dimension_numbers = #tpu.dot_dimension_numbers<[1], [0], [0], [1], [0, 0, 1, 1], [], []>} : vector<8x32xf32>, vector<32x32xf32>, vector<8x32xf32> -> vector<8x32xf32>
    %c0_124 = arith.constant 0 : index
    %c0_125 = arith.constant 0 : index
    %c0_126 = arith.constant 0 : index
    %164 = vector.load %arg6[%c0_124, %c0_125, %c0_126] : memref<3x32x32xf32, #tpu.memory_space<vmem>>, vector<1x32x32xf32>
    %165 = vector.shape_cast %164 : vector<1x32x32xf32> to vector<32x32xf32>
    %cst_127 = arith.constant dense<0.000000e+00> : vector<8x32xf32>
    %166 = tpu.matmul %160, %165, %cst_127 {dimension_numbers = #tpu.dot_dimension_numbers<[1], [0], [0], [1], [0, 0, 1, 1], [], []>} : vector<8x32xf32>, vector<32x32xf32>, vector<8x32xf32> -> vector<8x32xf32>
    %167 = arith.addf %163, %166 : vector<8x32xf32>
    %c1_128 = arith.constant 1 : index
    %c0_129 = arith.constant 0 : index
    %c0_130 = arith.constant 0 : index
    %168 = vector.load %arg5[%c1_128, %c0_129, %c0_130] : memref<3x32x32xf32, #tpu.memory_space<vmem>>, vector<1x32x32xf32>
    %169 = vector.shape_cast %168 : vector<1x32x32xf32> to vector<32x32xf32>
    %cst_131 = arith.constant dense<0.000000e+00> : vector<8x32xf32>
    %170 = tpu.matmul %159, %169, %cst_131 {dimension_numbers = #tpu.dot_dimension_numbers<[1], [0], [0], [1], [0, 0, 1, 1], [], []>} : vector<8x32xf32>, vector<32x32xf32>, vector<8x32xf32> -> vector<8x32xf32>
    %c1_132 = arith.constant 1 : index
    %c0_133 = arith.constant 0 : index
    %c0_134 = arith.constant 0 : index
    %171 = vector.load %arg6[%c1_132, %c0_133, %c0_134] : memref<3x32x32xf32, #tpu.memory_space<vmem>>, vector<1x32x32xf32>
    %172 = vector.shape_cast %171 : vector<1x32x32xf32> to vector<32x32xf32>
    %cst_135 = arith.constant dense<0.000000e+00> : vector<8x32xf32>
    %173 = tpu.matmul %160, %172, %cst_135 {dimension_numbers = #tpu.dot_dimension_numbers<[1], [0], [0], [1], [0, 0, 1, 1], [], []>} : vector<8x32xf32>, vector<32x32xf32>, vector<8x32xf32> -> vector<8x32xf32>
    %174 = arith.addf %170, %173 : vector<8x32xf32>
    %c2_136 = arith.constant 2 : index
    %c0_137 = arith.constant 0 : index
    %c0_138 = arith.constant 0 : index
    %175 = vector.load %arg5[%c2_136, %c0_137, %c0_138] : memref<3x32x32xf32, #tpu.memory_space<vmem>>, vector<1x32x32xf32>
    %176 = vector.shape_cast %175 : vector<1x32x32xf32> to vector<32x32xf32>
    %cst_139 = arith.constant dense<0.000000e+00> : vector<8x32xf32>
    %177 = tpu.matmul %159, %176, %cst_139 {dimension_numbers = #tpu.dot_dimension_numbers<[1], [0], [0], [1], [0, 0, 1, 1], [], []>} : vector<8x32xf32>, vector<32x32xf32>, vector<8x32xf32> -> vector<8x32xf32>
    %c2_140 = arith.constant 2 : index
    %c0_141 = arith.constant 0 : index
    %c0_142 = arith.constant 0 : index
    %178 = vector.load %arg6[%c2_140, %c0_141, %c0_142] : memref<3x32x32xf32, #tpu.memory_space<vmem>>, vector<1x32x32xf32>
    %179 = vector.shape_cast %178 : vector<1x32x32xf32> to vector<32x32xf32>
    %cst_143 = arith.constant dense<0.000000e+00> : vector<8x32xf32>
    %180 = tpu.matmul %160, %179, %cst_143 {dimension_numbers = #tpu.dot_dimension_numbers<[1], [0], [0], [1], [0, 0, 1, 1], [], []>} : vector<8x32xf32>, vector<32x32xf32>, vector<8x32xf32> -> vector<8x32xf32>
    %181 = arith.addf %177, %180 : vector<8x32xf32>
    %c0_144 = arith.constant 0 : index
    %c0_145 = arith.constant 0 : index
    %c0_146 = arith.constant 0 : index
    %182 = vector.load %arg7[%c0_144, %c0_145, %c0_146] : memref<3x32x32xf32, #tpu.memory_space<vmem>>, vector<1x32x32xf32>
    %183 = vector.shape_cast %182 : vector<1x32x32xf32> to vector<32x32xf32>
    %cst_147 = arith.constant dense<0.000000e+00> : vector<8x32xf32>
    %184 = tpu.matmul %152, %183, %cst_147 {dimension_numbers = #tpu.dot_dimension_numbers<[1], [0], [0], [1], [0, 0, 1, 1], [], []>} : vector<8x32xf32>, vector<32x32xf32>, vector<8x32xf32> -> vector<8x32xf32>
    %c1_148 = arith.constant 1 : index
    %c0_149 = arith.constant 0 : index
    %c0_150 = arith.constant 0 : index
    %185 = vector.load %arg7[%c1_148, %c0_149, %c0_150] : memref<3x32x32xf32, #tpu.memory_space<vmem>>, vector<1x32x32xf32>
    %186 = vector.shape_cast %185 : vector<1x32x32xf32> to vector<32x32xf32>
    %cst_151 = arith.constant dense<0.000000e+00> : vector<8x32xf32>
    %187 = tpu.matmul %152, %186, %cst_151 {dimension_numbers = #tpu.dot_dimension_numbers<[1], [0], [0], [1], [0, 0, 1, 1], [], []>} : vector<8x32xf32>, vector<32x32xf32>, vector<8x32xf32> -> vector<8x32xf32>
    %c2_152 = arith.constant 2 : index
    %c0_153 = arith.constant 0 : index
    %c0_154 = arith.constant 0 : index
    %188 = vector.load %arg7[%c2_152, %c0_153, %c0_154] : memref<3x32x32xf32, #tpu.memory_space<vmem>>, vector<1x32x32xf32>
    %189 = vector.shape_cast %188 : vector<1x32x32xf32> to vector<32x32xf32>
    %cst_155 = arith.constant dense<0.000000e+00> : vector<8x32xf32>
    %190 = tpu.matmul %152, %189, %cst_155 {dimension_numbers = #tpu.dot_dimension_numbers<[1], [0], [0], [1], [0, 0, 1, 1], [], []>} : vector<8x32xf32>, vector<32x32xf32>, vector<8x32xf32> -> vector<8x32xf32>
    %191 = arith.addf %167, %184 : vector<8x32xf32>
    %192 = vector.broadcast %6 : vector<1x32xf32> to vector<8x32xf32>
    %193 = arith.addf %191, %192 : vector<8x32xf32>
    %194 = arith.negf %193 : vector<8x32xf32>
    %195 = math.exp %194 : vector<8x32xf32>
    %cst_156 = arith.constant 1.000000e+00 : f32
    %196 = vector.broadcast %cst_156 : f32 to vector<8x32xf32>
    %197 = arith.addf %196, %195 : vector<8x32xf32>
    %198 = arith.divf %196, %197 : vector<8x32xf32>
    %199 = arith.addf %174, %187 : vector<8x32xf32>
    %200 = vector.broadcast %7 : vector<1x32xf32> to vector<8x32xf32>
    %201 = arith.addf %199, %200 : vector<8x32xf32>
    %202 = arith.negf %201 : vector<8x32xf32>
    %203 = math.exp %202 : vector<8x32xf32>
    %cst_157 = arith.constant 1.000000e+00 : f32
    %204 = vector.broadcast %cst_157 : f32 to vector<8x32xf32>
    %205 = arith.addf %204, %203 : vector<8x32xf32>
    %206 = arith.divf %204, %205 : vector<8x32xf32>
    %207 = vector.broadcast %8 : vector<1x32xf32> to vector<8x32xf32>
    %208 = arith.addf %181, %207 : vector<8x32xf32>
    %209 = vector.broadcast %9 : vector<1x32xf32> to vector<8x32xf32>
    %210 = arith.addf %190, %209 : vector<8x32xf32>
    %211 = arith.mulf %198, %210 : vector<8x32xf32>
    %212 = arith.addf %208, %211 : vector<8x32xf32>
    %213 = math.tanh %212 : vector<8x32xf32>
    %214 = arith.subf %152, %213 : vector<8x32xf32>
    %215 = arith.mulf %206, %214 : vector<8x32xf32>
    %216 = arith.addf %213, %215 : vector<8x32xf32>
    %cst_158 = arith.constant dense<0.000000e+00> : vector<8x32xf32>
    %217 = tpu.matmul %216, %1, %cst_158 {dimension_numbers = #tpu.dot_dimension_numbers<[1], [0], [0], [1], [0, 0, 1, 1], [], []>} : vector<8x32xf32>, vector<32x32xf32>, vector<8x32xf32> -> vector<8x32xf32>
    %218 = vector.broadcast %4 : vector<1x32xf32> to vector<8x32xf32>
    %219 = arith.addf %217, %218 : vector<8x32xf32>
    %cst_159 = arith.constant dense<0.000000e+00> : vector<8x32xf32>
    %220 = tpu.matmul %216, %3, %cst_159 {dimension_numbers = #tpu.dot_dimension_numbers<[1], [0], [0], [1], [0, 0, 1, 1], [], []>} : vector<8x32xf32>, vector<32x32xf32>, vector<8x32xf32> -> vector<8x32xf32>
    %221 = vector.broadcast %5 : vector<1x32xf32> to vector<8x32xf32>
    %222 = arith.addf %220, %221 : vector<8x32xf32>
    %cst_160 = arith.constant dense<0.000000e+00> : vector<8x32xf32>
    %223 = tpu.matmul %148, %219, %cst_160 {dimension_numbers = #tpu.dot_dimension_numbers<[1], [0], [0], [1], [0, 0, 1, 1], [], []>} : vector<8x8xf32>, vector<8x32xf32>, vector<8x32xf32> -> vector<8x32xf32>
    %cst_161 = arith.constant dense<0.000000e+00> : vector<8x32xf32>
    %224 = tpu.matmul %150, %222, %cst_161 {dimension_numbers = #tpu.dot_dimension_numbers<[1], [0], [0], [1], [0, 0, 1, 1], [], []>} : vector<8x8xf32>, vector<8x32xf32>, vector<8x32xf32> -> vector<8x32xf32>
    %c0_162 = arith.constant 0 : index
    %c0_163 = arith.constant 0 : index
    %c0_164 = arith.constant 0 : index
    %225 = vector.load %arg5[%c0_162, %c0_163, %c0_164] : memref<3x32x32xf32, #tpu.memory_space<vmem>>, vector<1x32x32xf32>
    %226 = vector.shape_cast %225 : vector<1x32x32xf32> to vector<32x32xf32>
    %cst_165 = arith.constant dense<0.000000e+00> : vector<8x32xf32>
    %227 = tpu.matmul %223, %226, %cst_165 {dimension_numbers = #tpu.dot_dimension_numbers<[1], [0], [0], [1], [0, 0, 1, 1], [], []>} : vector<8x32xf32>, vector<32x32xf32>, vector<8x32xf32> -> vector<8x32xf32>
    %c0_166 = arith.constant 0 : index
    %c0_167 = arith.constant 0 : index
    %c0_168 = arith.constant 0 : index
    %228 = vector.load %arg6[%c0_166, %c0_167, %c0_168] : memref<3x32x32xf32, #tpu.memory_space<vmem>>, vector<1x32x32xf32>
    %229 = vector.shape_cast %228 : vector<1x32x32xf32> to vector<32x32xf32>
    %cst_169 = arith.constant dense<0.000000e+00> : vector<8x32xf32>
    %230 = tpu.matmul %224, %229, %cst_169 {dimension_numbers = #tpu.dot_dimension_numbers<[1], [0], [0], [1], [0, 0, 1, 1], [], []>} : vector<8x32xf32>, vector<32x32xf32>, vector<8x32xf32> -> vector<8x32xf32>
    %231 = arith.addf %227, %230 : vector<8x32xf32>
    %c1_170 = arith.constant 1 : index
    %c0_171 = arith.constant 0 : index
    %c0_172 = arith.constant 0 : index
    %232 = vector.load %arg5[%c1_170, %c0_171, %c0_172] : memref<3x32x32xf32, #tpu.memory_space<vmem>>, vector<1x32x32xf32>
    %233 = vector.shape_cast %232 : vector<1x32x32xf32> to vector<32x32xf32>
    %cst_173 = arith.constant dense<0.000000e+00> : vector<8x32xf32>
    %234 = tpu.matmul %223, %233, %cst_173 {dimension_numbers = #tpu.dot_dimension_numbers<[1], [0], [0], [1], [0, 0, 1, 1], [], []>} : vector<8x32xf32>, vector<32x32xf32>, vector<8x32xf32> -> vector<8x32xf32>
    %c1_174 = arith.constant 1 : index
    %c0_175 = arith.constant 0 : index
    %c0_176 = arith.constant 0 : index
    %235 = vector.load %arg6[%c1_174, %c0_175, %c0_176] : memref<3x32x32xf32, #tpu.memory_space<vmem>>, vector<1x32x32xf32>
    %236 = vector.shape_cast %235 : vector<1x32x32xf32> to vector<32x32xf32>
    %cst_177 = arith.constant dense<0.000000e+00> : vector<8x32xf32>
    %237 = tpu.matmul %224, %236, %cst_177 {dimension_numbers = #tpu.dot_dimension_numbers<[1], [0], [0], [1], [0, 0, 1, 1], [], []>} : vector<8x32xf32>, vector<32x32xf32>, vector<8x32xf32> -> vector<8x32xf32>
    %238 = arith.addf %234, %237 : vector<8x32xf32>
    %c2_178 = arith.constant 2 : index
    %c0_179 = arith.constant 0 : index
    %c0_180 = arith.constant 0 : index
    %239 = vector.load %arg5[%c2_178, %c0_179, %c0_180] : memref<3x32x32xf32, #tpu.memory_space<vmem>>, vector<1x32x32xf32>
    %240 = vector.shape_cast %239 : vector<1x32x32xf32> to vector<32x32xf32>
    %cst_181 = arith.constant dense<0.000000e+00> : vector<8x32xf32>
    %241 = tpu.matmul %223, %240, %cst_181 {dimension_numbers = #tpu.dot_dimension_numbers<[1], [0], [0], [1], [0, 0, 1, 1], [], []>} : vector<8x32xf32>, vector<32x32xf32>, vector<8x32xf32> -> vector<8x32xf32>
    %c2_182 = arith.constant 2 : index
    %c0_183 = arith.constant 0 : index
    %c0_184 = arith.constant 0 : index
    %242 = vector.load %arg6[%c2_182, %c0_183, %c0_184] : memref<3x32x32xf32, #tpu.memory_space<vmem>>, vector<1x32x32xf32>
    %243 = vector.shape_cast %242 : vector<1x32x32xf32> to vector<32x32xf32>
    %cst_185 = arith.constant dense<0.000000e+00> : vector<8x32xf32>
    %244 = tpu.matmul %224, %243, %cst_185 {dimension_numbers = #tpu.dot_dimension_numbers<[1], [0], [0], [1], [0, 0, 1, 1], [], []>} : vector<8x32xf32>, vector<32x32xf32>, vector<8x32xf32> -> vector<8x32xf32>
    %245 = arith.addf %241, %244 : vector<8x32xf32>
    %c0_186 = arith.constant 0 : index
    %c0_187 = arith.constant 0 : index
    %c0_188 = arith.constant 0 : index
    %246 = vector.load %arg7[%c0_186, %c0_187, %c0_188] : memref<3x32x32xf32, #tpu.memory_space<vmem>>, vector<1x32x32xf32>
    %247 = vector.shape_cast %246 : vector<1x32x32xf32> to vector<32x32xf32>
    %cst_189 = arith.constant dense<0.000000e+00> : vector<8x32xf32>
    %248 = tpu.matmul %216, %247, %cst_189 {dimension_numbers = #tpu.dot_dimension_numbers<[1], [0], [0], [1], [0, 0, 1, 1], [], []>} : vector<8x32xf32>, vector<32x32xf32>, vector<8x32xf32> -> vector<8x32xf32>
    %c1_190 = arith.constant 1 : index
    %c0_191 = arith.constant 0 : index
    %c0_192 = arith.constant 0 : index
    %249 = vector.load %arg7[%c1_190, %c0_191, %c0_192] : memref<3x32x32xf32, #tpu.memory_space<vmem>>, vector<1x32x32xf32>
    %250 = vector.shape_cast %249 : vector<1x32x32xf32> to vector<32x32xf32>
    %cst_193 = arith.constant dense<0.000000e+00> : vector<8x32xf32>
    %251 = tpu.matmul %216, %250, %cst_193 {dimension_numbers = #tpu.dot_dimension_numbers<[1], [0], [0], [1], [0, 0, 1, 1], [], []>} : vector<8x32xf32>, vector<32x32xf32>, vector<8x32xf32> -> vector<8x32xf32>
    %c2_194 = arith.constant 2 : index
    %c0_195 = arith.constant 0 : index
    %c0_196 = arith.constant 0 : index
    %252 = vector.load %arg7[%c2_194, %c0_195, %c0_196] : memref<3x32x32xf32, #tpu.memory_space<vmem>>, vector<1x32x32xf32>
    %253 = vector.shape_cast %252 : vector<1x32x32xf32> to vector<32x32xf32>
    %cst_197 = arith.constant dense<0.000000e+00> : vector<8x32xf32>
    %254 = tpu.matmul %216, %253, %cst_197 {dimension_numbers = #tpu.dot_dimension_numbers<[1], [0], [0], [1], [0, 0, 1, 1], [], []>} : vector<8x32xf32>, vector<32x32xf32>, vector<8x32xf32> -> vector<8x32xf32>
    %255 = arith.addf %231, %248 : vector<8x32xf32>
    %256 = vector.broadcast %6 : vector<1x32xf32> to vector<8x32xf32>
    %257 = arith.addf %255, %256 : vector<8x32xf32>
    %258 = arith.negf %257 : vector<8x32xf32>
    %259 = math.exp %258 : vector<8x32xf32>
    %cst_198 = arith.constant 1.000000e+00 : f32
    %260 = vector.broadcast %cst_198 : f32 to vector<8x32xf32>
    %261 = arith.addf %260, %259 : vector<8x32xf32>
    %262 = arith.divf %260, %261 : vector<8x32xf32>
    %263 = arith.addf %238, %251 : vector<8x32xf32>
    %264 = vector.broadcast %7 : vector<1x32xf32> to vector<8x32xf32>
    %265 = arith.addf %263, %264 : vector<8x32xf32>
    %266 = arith.negf %265 : vector<8x32xf32>
    %267 = math.exp %266 : vector<8x32xf32>
    %cst_199 = arith.constant 1.000000e+00 : f32
    %268 = vector.broadcast %cst_199 : f32 to vector<8x32xf32>
    %269 = arith.addf %268, %267 : vector<8x32xf32>
    %270 = arith.divf %268, %269 : vector<8x32xf32>
    %271 = vector.broadcast %8 : vector<1x32xf32> to vector<8x32xf32>
    %272 = arith.addf %245, %271 : vector<8x32xf32>
    %273 = vector.broadcast %9 : vector<1x32xf32> to vector<8x32xf32>
    %274 = arith.addf %254, %273 : vector<8x32xf32>
    %275 = arith.mulf %262, %274 : vector<8x32xf32>
    %276 = arith.addf %272, %275 : vector<8x32xf32>
    %277 = math.tanh %276 : vector<8x32xf32>
    %278 = arith.subf %216, %277 : vector<8x32xf32>
    %279 = arith.mulf %270, %278 : vector<8x32xf32>
    %280 = arith.addf %277, %279 : vector<8x32xf32>
    %c1_200 = arith.constant 1 : index
    %c0_201 = arith.constant 0 : index
    %c0_202 = arith.constant 0 : index
    %281 = vector.load %arg9[%c1_200, %c0_201, %c0_202] : memref<2x8x32xf32, #tpu.memory_space<vmem>>, vector<1x8x32xf32>
    %282 = vector.shape_cast %281 : vector<1x8x32xf32> to vector<8x32xf32>
    %283 = vector.shape_cast %280 : vector<8x32xf32> to vector<1x8x32xf32>
    tpu.vector_store %arg9[%c1_200, %c0_201, %c0_202], %283 {strides = array<i32>} : memref<2x8x32xf32, #tpu.memory_space<vmem>>, vector<1x8x32xf32>,
    return
  }
  func.func @transform_0(%arg0: i32) -> (i32, i32, i32) {
    %c0_i32 = arith.constant 0 : i32
    %c0_i32_0 = arith.constant 0 : i32
    %c0_i32_1 = arith.constant 0 : i32
    return %arg0, %c0_i32, %c0_i32_0 : i32, i32, i32
  }
  func.func @transform_1(%arg0: i32) -> (i32, i32, i32) {
    %c0_i32 = arith.constant 0 : i32
    %c0_i32_0 = arith.constant 0 : i32
    %c0_i32_1 = arith.constant 0 : i32
    return %arg0, %c0_i32, %c0_i32_0 : i32, i32, i32
  }
  func.func @transform_2(%arg0: i32) -> (i32, i32, i32) {
    %c0_i32 = arith.constant 0 : i32
    %c0_i32_0 = arith.constant 0 : i32
    %c0_i32_1 = arith.constant 0 : i32
    return %arg0, %c0_i32, %c0_i32_0 : i32, i32, i32
  }
  func.func @transform_3(%arg0: i32) -> (i32, i32, i32) {
    %c0_i32 = arith.constant 0 : i32
    %c0_i32_0 = arith.constant 0 : i32
    %c0_i32_1 = arith.constant 0 : i32
    %c0_i32_2 = arith.constant 0 : i32
    return %c0_i32, %c0_i32_0, %c0_i32_1 : i32, i32, i32
  }
  func.func @transform_4(%arg0: i32) -> (i32, i32, i32) {
    %c0_i32 = arith.constant 0 : i32
    %c0_i32_0 = arith.constant 0 : i32
    %c0_i32_1 = arith.constant 0 : i32
    %c0_i32_2 = arith.constant 0 : i32
    return %c0_i32, %c0_i32_0, %c0_i32_1 : i32, i32, i32
  }
  func.func @transform_5(%arg0: i32) -> (i32, i32, i32) {
    %c0_i32 = arith.constant 0 : i32
    %c0_i32_0 = arith.constant 0 : i32
    %c0_i32_1 = arith.constant 0 : i32
    %c0_i32_2 = arith.constant 0 : i32
    return %c0_i32, %c0_i32_0, %c0_i32_1 : i32, i32, i32
  }
  func.func @transform_6(%arg0: i32) -> (i32, i32, i32) {
    %c0_i32 = arith.constant 0 : i32
    %c0_i32_0 = arith.constant 0 : i32
    %c0_i32_1 = arith.constant 0 : i32
    %c0_i32_2 = arith.constant 0 : i32
    return %c0_i32, %c0_i32_0, %c0_i32_1 : i32, i32, i32
  }
  func.func @transform_7(%arg0: i32) -> (i32, i32) {
    %c0_i32 = arith.constant 0 : i32
    %c0_i32_0 = arith.constant 0 : i32
    %c0_i32_1 = arith.constant 0 : i32
    return %c0_i32, %c0_i32_0 : i32, i32
  }
  func.func @transform_8(%arg0: i32) -> (i32, i32, i32) {
    %c0_i32 = arith.constant 0 : i32
    %c0_i32_0 = arith.constant 0 : i32
    %c0_i32_1 = arith.constant 0 : i32
    return %arg0, %c0_i32, %c0_i32_0 : i32, i32, i32
  }
}

</mosaic_0001>

<bundles_post_ra>
// kernel: tpu_custom_call.1
= control target key start
LH: loop header
LB: loop body
LE: loop exit
PB: predicated region body
PF: predicated region fallthrough
CT: control target
= control target key end

     0   :  { %s7047_s0 = inlined_call_operand.hbm [shape: f32[4,8,8], index: 0, kind: input, shape index: {}]   ;;  %s7048_s1 = inlined_call_operand.hbm [shape: f32[4,8,8], index: 1, kind: input, shape index: {}]   ;;  %s7049_s2 = inlined_call_operand.hbm [shape: f32[4,8,32], index: 2, kind: input, shape index: {}]   ;;  %s7050_s3 = inlined_call_operand.hbm [shape: f32[2,32,32], index: 3, kind: input, shape index: {}]   ;;  %s7051_s4 = inlined_call_operand.hbm [shape: f32[3,32,32], index: 4, kind: input, shape index: {}]   ;;  %s7052_s5 = inlined_call_operand.hbm [shape: f32[3,32,32], index: 5, kind: input, shape index: {}]   ;;  %s7053_s6 = inlined_call_operand.hbm [shape: f32[3,32,32], index: 6, kind: input, shape index: {}]   ;;  %s7054_s7 = inlined_call_operand.vmem [shape: f32[6,32], index: 7, kind: input, shape index: {}]   ;;  %s7055_s8 = inlined_call_operand.hbm [shape: f32[4,8,32], index: 8, kind: output, shape index: {}]  }
   0x1   :  { %7081 = sst [smem:[#allocation26_spill]] %s7048_s1 }
   0x2   :  { %7082 = sst [smem:[#allocation27_spill]] %s7050_s3 }
   0x3   :  { %7083 = sst [smem:[#allocation28_spill]] %s7052_s5 }
   0x4   :  { %7084 = sst [smem:[#allocation29_spill]] %s7055_s8 }
   0x5   :  { %13 = vsyncpa [#allocation3], 0 }
   0x6   :  { %15 = vsyncpa [#allocation3 + $0x1], 0 }
   0x7   :  { %16 = vsyncpa [#allocation6], 0 }
   0x8   :  { %18 = vsyncpa [#allocation6 + $0x1], 0 }
   0x9   :  { %19 = vsyncpa [#allocation9], 0 }
   0xa   :  { %20 = vsyncpa [#allocation12], 0 }
   0xb   :  { %21 = vsyncpa [#allocation4], 0 }
   0xc   :  { %23 = vsyncpa [#allocation4 + $0x1], 0  ;;  %s6156_s27 = smov 0   ;;  %s6158_s28 = smov 0  }
   0xd   :  { %s6160_s29 = smov 0   ;;  %s6162_s30 = smov 0  }
   0xe LB: > { %7085 = sst [smem:[#allocation20_spill]] %s6082_s27  ;;  %s6177_s9 = sadd.s32 4294967295, %s6094_s30   ;;  %s6094_s30 = sphi %s6162_s30, %s7124_s30   ;;  %s6090_s29 = sphi %s6160_s29, %s7128_s29   ;;  %s6086_s28 = sphi %s6158_s28, %s7127_s28   ;;  %s6082_s27 = sphi %s6156_s27, %s7126_s27  }
   0xf   : > { %7086 = sst [smem:[#allocation21_spill]] %s6094_s30  ;;  %s4542_s10 = sadd.s32 4294967294, %s6094_s30  }
  0x10   : > { %p49_p0 = scmp.ne.s32.totalorder %s6086_s28, %s6082_s27  ;;  %p7056_p1 = scmp.eq.s32.totalorder %s6177_s9, 0 }
  0x11   : > { %p236_p3 = scmp.eq.s32.totalorder %s4542_s10, 1  ;;  %p4543_p5 = scmp.ge.s32.totalorder %s6094_s30, 1 }
  0x12   : > { %p6186_p4 = por %p7056_p1, %p49_p0  ;;  %p243_p7 = scmp.lt.s32.totalorder %s6094_s30, 3 }
  0x13   : > { %p6191_p6 = por %p236_p3, %p49_p0  ;;  %s6096_s14 = smov [#allocation8]  }
  0x14   : > { %s7087_s11 = scalar_select %p6186_p4, 1, 0 }
  0x15   : > { %s7088_s12 = scalar_select %p6191_p6, 1, 0 }
  0x16   : > { %p6196_p8 = pnand %p4543_p5, %p243_p7  ;;  %s255_s15 = sshll.u32 %s6096_s14, 4  ;;  %s6200_s15 = int_to_ptr.vmem [resolvable:$true] %s255_s15 }
  0x17   : > { %7089 = sst [smem:[#allocation22_spill]] %s7088_s12  ;;  %s6097_s17 = smov [#allocation11]  }
  0x18   : > { %s7090_s13 = scalar_select %p6196_p8, 1, 0 }
  0x19   : > { %p5694_p9 = pneg %p6196_p8  ;;  %s281_s18 = sshll.u32 %s6097_s17, 4  ;;  %s6211_s18 = int_to_ptr.vmem [resolvable:$true] %s281_s18 }
  0x1a   : > { %s7092_s3 = sld [smem:[#allocation27_spill]] }
  0x1b   : > { %p6207_p11 = pnand %p5694_p9, %p7056_p1 }
  0x1d   : > { %s7091_s16 = scalar_select %p6207_p11, 1, 0 }
  0x1e   : > { %p6221_p13 = pneg %p6207_p11 }
  0x20   : > { %s5814_s21 = scalar_lea.hbm %s7092_s3, 1024 }
  0x21   : > { %p5815_p12 = scmp.ne.s32.totalorder %s7092_s3, %s5814_s21  ;;  %p5821_p5 = scmp.lt.u32.totalorder %s5814_s21, %s7092_s3 }
  0x22   : > { %s7093_s24 = scalar_select %p6221_p13, 1, 0 }
  0x23   : > { %p5817_p0 = pnand %p6221_p13, %p5815_p12 }
  0x25   : > { %p5818_p3 = pneg %p5817_p0 }
  0x27   : > { %p5823_p7 = pnand %p5821_p5, %p5818_p3 }
  0x29   : > { %5826 = shalt.err (!%p5823_p7)
}
  0x2a   : > { %s5827_s10 = scalar_lea.vmem %s6200_s15, 1024  ;;  %p5835_p2 = scmp.lt.s32.totalorder %s6200_s15, %s6200_s15 }
  0x2b   : > { %p5828_p9 = scmp.ne.s32.totalorder %s6200_s15, %s5827_s10  ;;  %p5836_p6 = scmp.lt.s32.totalorder %s5827_s10, %s5827_s10 }
  0x2d   : > { %p5830_p10 = pnand %p5828_p9, %p6221_p13  ;;  %p5837_p12 = por %p5836_p6, %p5835_p2 }
  0x2f   : > { %p5831_p1 = pneg %p5830_p10 }
  0x31   : > { %p5838_p0 = pnand %p5837_p12, %p5831_p1 }
  0x33   : > { %5841 = shalt.err (!%p5838_p0)
}
  0x34   : > { %s7059_s14 = smov 128   ;;  %s7061_s17 = smov 8  }
  0x35   : > { %5697 = dma.hbm_to_vmem [thread:$0]  (!%p6207_p11), %s7092_s3, 1024, %s6200_s15, [#allocation9], %s7059_s14, %s7059_s14, %s7061_s17  }
  0x36   : > { %s7094_s5 = sld [smem:[#allocation28_spill]] }
  0x3c   : > { %s5842_s23 = scalar_lea.hbm %s7094_s5, 1536 }
  0x3d   : > { %p5843_p1 = scmp.ne.s32.totalorder %s7094_s5, %s5842_s23  ;;  %p5849_p10 = scmp.lt.u32.totalorder %s5842_s23, %s7094_s5 }
  0x3f   : > { %p5845_p2 = pnand %p5843_p1, %p6221_p13 }
  0x41   : > { %p5846_p6 = pneg %p5845_p2 }
  0x43   : > { %p5851_p3 = pnand %p5849_p10, %p5846_p6 }
  0x45   : > { %5854 = shalt.err (!%p5851_p3)
}
  0x46   : > { %s5855_s15 = scalar_lea.vmem %s6211_s18, 1536  ;;  %p5863_p12 = scmp.lt.s32.totalorder %s6211_s18, %s6211_s18 }
  0x47   : > { %p5856_p5 = scmp.ne.s32.totalorder %s6211_s18, %s5855_s15  ;;  %p5864_p0 = scmp.lt.s32.totalorder %s5855_s15, %s5855_s15 }
  0x49   : > { %p5858_p7 = pnand %p5856_p5, %p6221_p13  ;;  %p5865_p1 = por %p5864_p0, %p5863_p12 }
  0x4b   : > { %p5859_p9 = pneg %p5858_p7 }
  0x4d   : > { %p5866_p2 = pnand %p5865_p1, %p5859_p9 }
  0x4f   : > { %5869 = shalt.err (!%p5866_p2)
}
  0x50   : > { %5703 = dma.hbm_to_vmem [thread:$0]  (!%p6207_p11), %s7094_s5, 1536, %s6211_s18, [#allocation12], %s7059_s14, %s7059_s14, %s7061_s17  }
  0x51   : > { %s6272_s20 = sadd.s32 1, %s6094_s30   ;;  %s36_s21 = sadd.s32 1, %s6090_s29 }
  0x52   : > { %7095 = sst [smem:[#allocation23_spill]] %s6272_s20  ;;  %s33_s22 = ssub.s32 %s6094_s30, %s6272_s20 }
  0x53   : > { %p43_p6 = scmp.ne.s32.totalorder %s6090_s29, %s6086_s28  ;;  %p34_p10 = scmp.eq.s32.totalorder %s33_s22, 0 }
  0x54   : > { %p44_p3 = scmp.eq.s32.totalorder %s6094_s30, 0  ;;  %p7096_p5 = scmp.eq.s32.totalorder %s6177_s9, 1 }
  0x55   : > { %p5725_p9 = scmp.lt.s32.totalorder %s6094_s30, 2  ;;  %s7058_s26 = sand.u32 1, %s6090_s29  }
  0x56   : > { %p6282_p7 = por %p7096_p5, %p43_p6  ;;  %p45_p12 = por %p44_p3, %p43_p6 }
  0x57   : > { %s6288_s25 = scalar_select %p34_p10, %s6090_s29, %s36_s21  }
  0x58   : > { %s7097_s23 = scalar_select %p6282_p7, 1, 0 }
  0x59   : > { %7099 = sst [smem:[#allocation25_spill]] %s6288_s25  ;;  %s6293_s18 = sshll.u32 %s7058_s26, 4 }
  0x5a   : > { %7098 = sst [smem:[#allocation24_spill]] %s7097_s23  ;;  %s6296_s10 = sshll.u32 %s6094_s30, 8 }
  0x5b   : > { %p6298_p0 = pnand %p5725_p9, %p45_p12  ;;  %s332_s12 = sand.u32 1, %s6094_s30  }
  0x5c   : > { %s7101_s1 = sld [smem:[#allocation26_spill]]  ;;  %s336_s26 = scalar_lea.vmem [#allocation5], %s6293_s18 }
  0x5d   : > { %s7100_s15 = scalar_select %p6298_p0, 1, 0 }
  0x5e   : > { %s343_s14 = sshll.u32 %s336_s26, 4  ;;  %s6100_s17 = smov [#allocation10]   ;;  %s6310_s14 = int_to_ptr.vmem [resolvable:$true] %s343_s14 }
  0x5f   : > { %s6312_s3 = sshll.u32 %s6100_s17, 4  ;;  %s6314_s5 = scalar_lea.sflag [#allocation6], %s332_s12  ;;  %s269_s3 = int_to_ptr.vmem [resolvable:$true] %s6312_s3 }
  0x60   : > { %p6320_p2 = pneg %p6298_p0 }
  0x62   : > { %s6307_s21 = scalar_lea.hbm %s7101_s1, %s6296_s10  ;;  %s5875_s20 = scalar_lea.hbm %s7101_s1, 512 }
  0x63   : > { %s5870_s25 = scalar_lea.hbm %s6307_s21, 256  ;;  %p5876_p3 = scmp.lt.u32.totalorder %s6307_s21, %s7101_s1 }
  0x64   : > { %p5871_p1 = scmp.ne.s32.totalorder %s6307_s21, %s5870_s25  ;;  %p5877_p5 = scmp.lt.u32.totalorder %s5875_s20, %s5870_s25 }
  0x65   : > { %s7102_s19 = scalar_select %p6320_p2, 1, 0 }
  0x66   : > { %p5873_p6 = pnand %p6320_p2, %p5871_p1  ;;  %p5878_p9 = por %p5877_p5, %p5876_p3 }
  0x67   : > { %p5879_p12 = scmp.lt.u32.totalorder %s5870_s25, %s6307_s21 }
  0x68   : > { %p5874_p10 = pneg %p5873_p6 }
  0x69   : > { %p5880_p7 = por %p5879_p12, %p5878_p9 }
  0x6b   : > { %p5881_p4 = pnand %p5880_p7, %p5874_p10 }
  0x6d   : > { %5884 = shalt.err (!%p5881_p4)
}
  0x6e   : > { %s5885_s12 = scalar_lea.vmem %s6310_s14, 256  ;;  %s6101_s22 = smov [#allocation5]  }
  0x6f   : > { %p5886_p1 = scmp.ne.s32.totalorder %s6310_s14, %s5885_s12  ;;  %s5890_s26 = sshll.u32 %s6101_s22, 4  ;;  %s5891_s26 = int_to_ptr.vmem [resolvable:$false] %s5890_s26 }
  0x70   : > { %s5892_s30 = scalar_lea.vmem %s5891_s26, 512  ;;  %p5893_p11 = scmp.lt.s32.totalorder %s6310_s14, %s5891_s26 }
  0x71   : > { %p5888_p6 = pnand %p5886_p1, %p6320_p2  ;;  %p5894_p13 = scmp.lt.s32.totalorder %s5892_s30, %s5885_s12 }
  0x73   : > { %p5889_p8 = pneg %p5888_p6  ;;  %p5895_p3 = por %p5894_p13, %p5893_p11 }
  0x75   : > { %p5896_p5 = pnand %p5895_p3, %p5889_p8 }
  0x77   : > { %5899 = shalt.err (!%p5896_p5)
}
  0x78   : > { %s7103_s20 = smov 8   ;;  %s7104_s25 = smov 128  }
  0x79   : > { %5713 = dma.hbm_to_vmem [thread:$0]  (!%p6298_p0), %s6307_s21, 256, %s6310_s14, %s6314_s5, %s7104_s25, %s7104_s25, %s7103_s20  }
  0x7a   : > { %s5900_s26 = scalar_lea.hbm %s7051_s4, 1536  ;;  %p7105_p8 = scmp.ne.s32.totalorder %s7093_s24, 0 }
  0x7b   : > { %p5901_p4 = scmp.ne.s32.totalorder %s7051_s4, %s5900_s26  ;;  %p5907_p7 = scmp.lt.u32.totalorder %s5900_s26, %s7051_s4 }
  0x7d   : > { %p5903_p11 = pnand %p5901_p4, %p7105_p8 }
  0x7f   : > { %p5904_p13 = pneg %p5903_p11 }
  0x81   : > { %p5909_p10 = pnand %p5907_p7, %p5904_p13 }
  0x83   : > { %5912 = shalt.err (!%p5909_p10)
}
  0x84   : > { %s5913_s8 = scalar_lea.vmem %s269_s3, 1536  ;;  %p5921_p6 = scmp.lt.s32.totalorder %s269_s3, %s269_s3 }
  0x85   : > { %p5914_p9 = scmp.ne.s32.totalorder %s269_s3, %s5913_s8  ;;  %p5922_p3 = scmp.lt.s32.totalorder %s5913_s8, %s5913_s8 }
  0x87   : > { %p5916_p12 = pnand %p5914_p9, %p7105_p8  ;;  %p5923_p5 = por %p5922_p3, %p5921_p6 }
  0x89   : > { %p5917_p1 = pneg %p5916_p12 }
  0x8b   : > { %p5924_p0 = pnand %p5923_p5, %p5917_p1 }
  0x8d   : > { %5927 = shalt.err (!%p5924_p0)
}
  0x8e   : > { %p7106_p4 = scmp.ne.s32.totalorder %s7091_s16, 0  ;;  %s6102_s14 = smov [#allocation13]  }
  0x8f   : > { %s294_s21 = sshll.u32 %s6102_s14, 4  ;;  %s5928_s8 = scalar_lea.hbm %s7053_s6, 1536  ;;  %s295_s21 = int_to_ptr.vmem [resolvable:$true] %s294_s21 }
  0x90   : > { %5700 = dma.hbm_to_vmem [thread:$0]  (!%p7106_p4), %s7051_s4, 1536, %s269_s3, [#allocation9], %s7104_s25, %s7104_s25, %s7103_s20  }
  0x91   : > { %p5929_p0 = scmp.ne.s32.totalorder %s7053_s6, %s5928_s8  ;;  %p5935_p7 = scmp.lt.u32.totalorder %s5928_s8, %s7053_s6 }
  0x93   : > { %p5931_p11 = pnand %p5929_p0, %p7105_p8 }
  0x95   : > { %p5932_p13 = pneg %p5931_p11 }
  0x97   : > { %p5937_p10 = pnand %p5935_p7, %p5932_p13 }
  0x99   : > { %5940 = shalt.err (!%p5937_p10)
}
  0x9a   : > { %s5941_s3 = scalar_lea.vmem %s295_s21, 1536  ;;  %p5949_p6 = scmp.lt.s32.totalorder %s295_s21, %s295_s21 }
  0x9b   : > { %p5942_p9 = scmp.ne.s32.totalorder %s295_s21, %s5941_s3  ;;  %p5950_p3 = scmp.lt.s32.totalorder %s5941_s3, %s5941_s3 }
  0x9d   : > { %p5944_p12 = pnand %p5942_p9, %p7105_p8  ;;  %p5951_p5 = por %p5950_p3, %p5949_p6 }
  0x9f   : > { %p5945_p1 = pneg %p5944_p12 }
  0xa1   : > { %p5952_p2 = pnand %p5951_p5, %p5945_p1 }
  0xa3   : > { %5955 = shalt.err (!%p5952_p2)
}
  0xa4   : > { %5706 = dma.hbm_to_vmem [thread:$0]  (!%p7106_p4), %s7053_s6, 1536, %s295_s21, [#allocation12], %s7104_s25, %s7104_s25, %s7103_s20  }
  0xa5   : > { %s6394_s14 = scalar_lea.hbm %s7047_s0, %s6296_s10  ;;  %s315_s16 = scalar_lea.vmem [#allocation2], %s6293_s18 }
  0xa6   : > { %s322_s17 = sshll.u32 %s315_s16, 4  ;;  %s7107_s22 = sand.u32 1, %s6090_s29   ;;  %s6397_s17 = int_to_ptr.vmem [resolvable:$true] %s322_s17 }
  0xa7   : > { %s6401_s8 = scalar_lea.sflag [#allocation3], %s7107_s22  ;;  %s5956_s26 = scalar_lea.hbm %s6394_s14, 256 }
  0xa8   : > { %p5957_p2 = scmp.ne.s32.totalorder %s6394_s14, %s5956_s26  ;;  %p7108_p8 = scmp.ne.s32.totalorder %s7102_s19, 0 }
  0xa9   : > { %s5961_s30 = scalar_lea.hbm %s7047_s0, 512  ;;  %p5962_p11 = scmp.lt.u32.totalorder %s6394_s14, %s7047_s0 }
  0xaa   : > { %p5959_p4 = pnand %p5957_p2, %p7108_p8  ;;  %p5963_p13 = scmp.lt.u32.totalorder %s5961_s30, %s5956_s26 }
  0xab   : > { %p5965_p10 = scmp.lt.u32.totalorder %s5956_s26, %s6394_s14 }
  0xac   : > { %p5960_p0 = pneg %p5959_p4  ;;  %p5964_p7 = por %p5963_p13, %p5962_p11 }
  0xae   : > { %p5966_p9 = por %p5965_p10, %p5964_p7 }
  0xb0   : > { %p5967_p12 = pnand %p5966_p9, %p5960_p0 }
  0xb2   : > { %5970 = shalt.err (!%p5967_p12)
}
  0xb3   : > { %s5971_s1 = scalar_lea.vmem %s6397_s17, 256  ;;  %s6103_s24 = smov [#allocation2]  }
  0xb4   : > { %p5972_p1 = scmp.ne.s32.totalorder %s6397_s17, %s5971_s1  ;;  %s5976_s27 = sshll.u32 %s6103_s24, 4  ;;  %s5977_s27 = int_to_ptr.vmem [resolvable:$false] %s5976_s27 }
  0xb5   : > { %s5978_s16 = scalar_lea.vmem %s5977_s27, 512  ;;  %p5979_p5 = scmp.lt.s32.totalorder %s6397_s17, %s5977_s27 }
  0xb6   : > { %p5974_p6 = pnand %p5972_p1, %p7108_p8  ;;  %p5980_p2 = scmp.lt.s32.totalorder %s5978_s16, %s5971_s1 }
  0xb8   : > { %p5975_p3 = pneg %p5974_p6  ;;  %p5981_p4 = por %p5980_p2, %p5979_p5 }
  0xba   : > { %p5982_p11 = pnand %p5981_p4, %p5975_p3 }
  0xbc   : > { %5985 = shalt.err (!%p5982_p11)
}
  0xbd   : > { %p7109_p0 = scmp.ne.s32.totalorder %s7100_s15, 0  ;;  %s6432_s21 = scalar_lea.hbm %s7049_s2, %s6296_s10 }
  0xbe   : > { %s357_s12 = scalar_lea.vmem [#allocation7], %s6293_s18  ;;  %s5986_s3 = scalar_lea.hbm %s6432_s21, 256 }
  0xbf   : > { %5710 = dma.hbm_to_vmem [thread:$0]  (!%p7109_p0), %s6394_s14, 256, %s6397_s17, %s6401_s8, %s7104_s25, %s7104_s25, %s7103_s20  }
  0xc0   : > { %s364_s30 = sshll.u32 %s357_s12, 4  ;;  %p5987_p13 = scmp.ne.s32.totalorder %s6432_s21, %s5986_s3  ;;  %s6435_s30 = int_to_ptr.vmem [resolvable:$true] %s364_s30 }
  0xc1   : > { %s5991_s17 = scalar_lea.hbm %s7049_s2, 512  ;;  %p5992_p9 = scmp.lt.u32.totalorder %s6432_s21, %s7049_s2 }
  0xc2   : > { %p5989_p7 = pnand %p5987_p13, %p7108_p8  ;;  %p5993_p12 = scmp.lt.u32.totalorder %s5991_s17, %s5986_s3 }
  0xc3   : > { %p5995_p6 = scmp.lt.u32.totalorder %s5986_s3, %s6432_s21 }
  0xc4   : > { %p5990_p10 = pneg %p5989_p7  ;;  %p5994_p1 = por %p5993_p12, %p5992_p9 }
  0xc6   : > { %p5996_p3 = por %p5995_p6, %p5994_p1 }
  0xc8   : > { %p5997_p5 = pnand %p5996_p3, %p5990_p10 }
  0xca   : > { %6000 = shalt.err (!%p5997_p5)
}
  0xcb   : > { %s6001_s18 = scalar_lea.vmem %s6435_s30, 256  ;;  %s6104_s1 = smov [#allocation7]  }
  0xcc   : > { %p6002_p2 = scmp.ne.s32.totalorder %s6435_s30, %s6001_s18  ;;  %s6006_s24 = sshll.u32 %s6104_s1, 4  ;;  %s6007_s24 = int_to_ptr.vmem [resolvable:$false] %s6006_s24 }
  0xcd   : > { %s6008_s27 = scalar_lea.vmem %s6007_s24, 512  ;;  %p6009_p13 = scmp.lt.s32.totalorder %s6435_s30, %s6007_s24 }
  0xce   : > { %p6004_p4 = pnand %p6002_p2, %p7108_p8  ;;  %p6010_p7 = scmp.lt.s32.totalorder %s6008_s27, %s6001_s18 }
  0xd0   : > { %p6005_p11 = pneg %p6004_p4  ;;  %p6011_p9 = por %p6010_p7, %p6009_p13 }
  0xd2   : > { %p6012_p12 = pnand %p6011_p9, %p6005_p11 }
  0xd4   : > { %6015 = shalt.err (!%p6012_p12)
}
  0xd5   : > { %5716 = dma.hbm_to_vmem [thread:$0]  (!%p7109_p0), %s6432_s21, 256, %s6435_s30, %s6314_s5, %s7104_s25, %s7104_s25, %s7103_s20  }
  0xd6   : > { %p7110_p8 = scmp.ne.s32.totalorder %s7090_s13, 0 }
  0xd7   : > { %s6465_s19 = sand.u32 (!%p7110_p8), 1, %s6086_s28   ;;  %p7111_p10 = scmp.ne.s32.totalorder (!%p7110_p8), %s7087_s11, 0 }
  0xd8   : > { %376 = sbr.rel (%p7110_p8) target bundleno = 2879 (0xb3f), region = 52  ;;  %s6468_s16 = sshll.u32 (!%p7110_p8), %s6465_s19, 4 }
  0xd9   : > { %s379_s15 = scalar_lea.sflag (!%p7110_p8), [#allocation3], %s6465_s19  ;;  %s382_s22 = scalar_lea.vmem (!%p7110_p8), [#allocation2], %s6468_s16 }
  0xdf   : > { %6061 = dma.done.wait (%p7111_p10), %s379_s15, 256  }
  0xe0   : > { %6063 = vsyncadd (%p7111_p10), %s379_s15, 4294967040  ;;  %s387_s5 = sand.u32 1, %s6177_s9   ;;  %s391_s20 = scalar_lea.vmem [#allocation5], %s6468_s16 }
  0xe1   : > { %s388_s13 = scalar_lea.sflag [#allocation6], %s387_s5 }
  0xe2   : > { %6065 = dma.done.wait (%p7111_p10), %s388_s13, 512  }
  0xe3   : > { %6067 = vsyncadd (%p7111_p10), %s388_s13, 4294966784  ;;  %s400_s25 = scalar_lea.vmem [#allocation7], %s6468_s16  ;;  %p7112_p0 = scmp.eq.s32.totalorder %s6177_s9, 0 }
  0xe5   : > { %6069 = dma.done.wait (%p7112_p0), [#allocation9], 2560   ;;  %p7113_p1 = pmov %p7112_p0 }
  0xe6   : > { %p7114_p6 = pmov %p7112_p0 }
  0xe7   : > { %6071 = vsyncadd (%p7113_p1), [#allocation9], 4294964736 }
  0xe8   : > { %6073 = dma.done.wait (%p7114_p6), [#allocation12], 3072   ;;  %p7115_p3 = pmov %p7112_p0 }
  0xe9   : > { %v6105_v0 = vmov 0.0|0.0   ;;  %vm6106_vm0 = vmmov 0   ;;  %v6107_v1 = vmov 0.0   ;;  %v463_v2 = vld [vmem:[#allocation8] sm:$0xff]  ;;  %v464_v3 = vld [vmem:[#allocation8 + $0x8] sm:$0xff]  ;;  %v465_v7 = vld [vmem:[#allocation8 + $0x10] sm:$0xff] }
  0xea   : > { %6075 = vsyncadd (%p7115_p3), [#allocation12], 4294964224  ;;  %5406 = vmatprep.subr.bf16.mxu0 %v6105_v0  ;;  %5412 = vmatprep.subr.bf16.mxu1 %v6105_v0  ;;  %v468_v4 = vld [vmem:[#allocation8 + $0x20] sm:$0xff]  ;;  %v6497_v5 = vpack.c.bf16 %v464_v3, %v463_v2  ;;  %v469_v6 = vld [vmem:[#allocation8 + $0x28] sm:$0xff]  ;;  %vm485_vm1 = vcmask 261120   ;;  %vm633_vm2 = vcmask 64512  }
  0xeb   : > { %4890 = vmatprep.mubr.msk.f32.mxu0 %vm6106_vm0, %v6107_v1  ;;  %4901 = vmatprep.mubr.msk.f32.mxu1 %vm6106_vm0, %v6107_v1  ;;  %v466_v8 = vld [vmem:[#allocation8 + $0x18] sm:$0xff]  ;;  %v6499_v9 = vpack.c.bf16 %v469_v6, %v468_v4  ;;  %v470_v10 = vld [vmem:[#allocation8 + $0x30] sm:$0xff]  ;;  %v784_v15 = vld [vmem:[#allocation11] sm:$0xff]  ;;  %s6832_s1 = scalar_lea.vmem [#allocation14], %s6468_s16  ;;  %s7116_s24 = sld [smem:[#allocation24_spill]] }
  0xec   : > { %v471_v11 = vld [vmem:[#allocation8 + $0x38] sm:$0xff]  ;;  %5408 = vmatpush3.bf16.msra.mxu0 %v6497_v5  ;;  %v6502_v12 = vpack.c.bf16 %v466_v8, %v465_v7  ;;  %v6512_v14 = vld [vmem:[%s400_s25] sm:$0xff]  ;;  %v785_v16 = vld [vmem:[#allocation11 + $0x8] sm:$0xff]  ;;  %s4645_s27 = sshll.u32 %s6177_s9, 8  ;;  %s4388_s16 = sshll.u32 %s6832_s1, 4  ;;  %s7001_s16 = int_to_ptr.vmem [resolvable:$true] %s4388_s16 }
  0xed   : > { %5409 = vmatprep.subr.bf16.mxu0 %v6105_v0  ;;  %5414 = vmatpush3.bf16.msra.mxu1 %v6499_v9  ;;  %v6506_v13 = vpack.c.bf16 %v471_v11, %v470_v10  ;;  %v6525_v17 = vpack.c.bf16 %v785_v16, %v784_v15  ;;  %v6532_v18 = vld [vmem:[%s7054_s7] ss:$0 sm:$0xff]  ;;  %v6537_v19 = vld [vmem:[%s7054_s7 + $0x1] ss:$0 sm:$0xff]  ;;  %v781_v28 = vld [vmem:[#allocation10 + $0x8] sm:$0xff]  ;;  %s7117_s5 = sld [smem:[#allocation29_spill]] }
  0xee   : > { %5415 = vmatprep.subr.bf16.mxu1 %v6105_v0  ;;  %v6542_v24 = vld [vmem:[%s382_s22] sm:$0xff]  ;;  %v783_v32 = vld [vmem:[#allocation10 + $0x18] sm:$0xff]  ;;  %v936_v38 = vld [vmem:[#allocation10 + $0x28] sm:$0xff]  ;;  %s6108_s9 = smov [#allocation14]  }
  0xef   : > { %v780_v27 = vld [vmem:[#allocation10] sm:$0xff]  ;;  %v782_v31 = vld [vmem:[#allocation10 + $0x10] sm:$0xff]  ;;  %v787_v35 = vld [vmem:[#allocation11 + $0x18] sm:$0xff]  ;;  %s6020_s11 = sshll.u32 %s6108_s9, 4  ;;  %s6021_s11 = int_to_ptr.vmem [resolvable:$false] %s6020_s11 }
  0xf0   : > { %5411 = vmatpush3.bf16.msra.mxu0 %v6502_v12  ;;  %v6552_v29 = vld [vmem:[%s391_s20] sm:$0xff]  ;;  %v6554_v30 = vpack.c.bf16 %v781_v28, %v780_v27  ;;  %v6560_v33 = vpack.c.bf16 %v783_v32, %v782_v31  ;;  %v941_v41 = vld [vmem:[#allocation11 + $0x28] sm:$0xff]  ;;  %v938_v43 = vld [vmem:[#allocation10 + $0x38] sm:$0xff]  ;;  %s6022_s26 = scalar_lea.vmem %s6021_s11, 512  ;;  %p6023_p13 = scmp.lt.s32.totalorder %s7001_s16, %s6021_s11 }
  0xf1   : > { %5417 = vmatpush3.bf16.msra.mxu1 %v6506_v13  ;;  %5418 = vmatprep.subr.bf16.mxu0 %v6105_v0  ;;  %v786_v34 = vld [vmem:[#allocation11 + $0x10] sm:$0xff]  ;;  %v935_v37 = vld [vmem:[#allocation10 + $0x20] sm:$0xff]  ;;  %v943_v49 = vld [vmem:[#allocation11 + $0x38] sm:$0xff]  ;;  %p7118_p2 = scmp.ne.s32.totalorder %s7116_s24, 0 }
  0xf2   : > { %4904 = vmatprep.subr.mxu1 %v6107_v1  ;;  %v6567_v36 = vpack.c.bf16 %v787_v35, %v786_v34  ;;  %v6571_v39 = vpack.c.bf16 %v936_v38, %v935_v37  ;;  %v940_v40 = vld [vmem:[#allocation11 + $0x20] sm:$0xff]  ;;  %v937_v42 = vld [vmem:[#allocation10 + $0x30] sm:$0xff]  ;;  %v1086_v51 = vld [vmem:[#allocation10 + $0x48] sm:$0xff] }
  0xf3   : > { %4891 = vmatmul.mubr.msk.f32.vlgmr.msra.gmra.mrb[0].mxu0 %vm485_vm1, %v6512_v14  ;;  %v6575_v46 = vpack.c.bf16 %v941_v41, %v940_v40  ;;  %v6577_v47 = vpack.c.bf16 %v938_v43, %v937_v42  ;;  %v942_v48 = vld [vmem:[#allocation11 + $0x30] sm:$0xff]  ;;  %v1085_v50 = vld [vmem:[#allocation10 + $0x40] sm:$0xff]  ;;  %v1091_v57 = vld [vmem:[#allocation11 + $0x48] sm:$0xff]  ;;  %s6999_s13 = scalar_lea.hbm %s7117_s5, %s4645_s27 }
  0xf4   : > { %4902 = vmatmul.mubr.msk.f32.vlgmr.msra.gmra.mrb[0].mxu1 %vm485_vm1, %v6512_v14  ;;  %4922 = vmatprep.mubr.msk.f32.mxu0 %vm6106_vm0, %v6107_v1  ;;  %v6585_v54 = vpack.c.bf16 %v943_v49, %v942_v48  ;;  %v6587_v55 = vpack.c.bf16 %v1086_v51, %v1085_v50  ;;  %v1090_v56 = vld [vmem:[#allocation11 + $0x40] sm:$0xff]  ;;  %v1087_v58 = vld [vmem:[#allocation10 + $0x50] sm:$0xff]  ;;  %v1088_v59 = vld [vmem:[#allocation10 + $0x58] sm:$0xff] }
  0xf5   : > { %4906 = vmatprep.mubr.msk.f32.mxu1 %vm6106_vm0, %v6107_v1  ;;  %5420 = vmatpush3.bf16.msra.mxu0 %v6525_v17  ;;  %v6596_v60 = vpack.c.bf16 %v1091_v57, %v1090_v56  ;;  %v6598_v61 = vpack.c.bf16 %v1088_v59, %v1087_v58  ;;  %v1092_v62 = vld [vmem:[#allocation11 + $0x50] sm:$0xff]  ;;  %v1093_v63 = vld [vmem:[#allocation11 + $0x58] sm:$0xff]  ;;  %v1309_v2 = vld [vmem:[#allocation13 + $0x20] sm:$0xff] }
  0xf6   : > { %5421 = vmatprep.subr.bf16.mxu0 %v6105_v0  ;;  %v1310_v3 = vld [vmem:[#allocation13 + $0x28] sm:$0xff]  ;;  %v6607_v4 = vpack.c.bf16 %v1093_v63, %v1092_v62  ;;  %v1234_v7 = vld [vmem:[#allocation13] sm:$0xff]  ;;  %v1311_v10 = vld [vmem:[#allocation13 + $0x30] sm:$0xff] }
  0xf7   : > { %v6609_v6 = vpack.c.bf16 %v1310_v3, %v1309_v2  ;;  %v1235_v8 = vld [vmem:[#allocation13 + $0x8] sm:$0xff]  ;;  %v1312_v11 = vld [vmem:[#allocation13 + $0x38] sm:$0xff]  ;;  %v1386_v27 = vld [vmem:[#allocation13 + $0x50] sm:$0xff] }
  0xf8   : > { %v6618_v15 = vpack.c.bf16 %v1235_v8, %v1234_v7  ;;  %v6620_v16 = vpack.c.bf16 %v1312_v11, %v1311_v10  ;;  %v1387_v28 = vld [vmem:[#allocation13 + $0x58] sm:$0xff]  ;;  %v6668_v57 = vld [vmem:[%s7054_s7 + $0x2] ss:$0 sm:$0xff]  ;;  %v6674_v3 = vld [vmem:[%s7054_s7 + $0x3] ss:$0 sm:$0xff] }
  0xf9   : > { %5423 = vmatpush3.bf16.msra.mxu0 %v6567_v36  ;;  %v6648_v31 = vpack.c.bf16 %v1387_v28, %v1386_v27  ;;  %v6686_v27 = vld [vmem:[%s7054_s7 + $0x4] ss:$0 sm:$0xff] }
  0xfa   : > { %5430 = vmatprep.subr.bf16.mxu0 %v6105_v0 }
 0x1c6   : > { %v555_v20 = vpop.f32.mrb[0].mxu0 }
 0x1c7   : > { %v556_v21 = vadd.f32 %v6532_v18, %v555_v20  ;;  %v4892_v22 = vpop.f32.mrb[1].mxu0  ;;  %v629_v23 = vpop.f32.mrb[0].mxu1  ;;  %v1236_v20 = vld [vmem:[#allocation13 + $0x10] sm:$0xff] }
 0x1c8   : > { %v630_v25 = vadd.f32 %v6537_v19, %v629_v23  ;;  %v4903_v26 = vpop.f32.mrb[1].mxu1  ;;  %v1384_v23 = vld [vmem:[#allocation13 + $0x40] sm:$0xff] }
 0x1c9   : > { %4905 = vmatpush3.msra.mxu1 %v556_v21  ;;  %v1237_v21 = vld [vmem:[#allocation13 + $0x18] sm:$0xff] }
 0x1ca   : > { %4907 = vmatmul.mubr.msk.f32.vlgmr.msra.gmra.mrb[2].mxu1 %vm633_vm2, %v6542_v24  ;;  %4909 = vmatprep.subr.mxu1 %v6107_v1  ;;  %v6629_v22 = vpack.c.bf16 %v1237_v21, %v1236_v20 }
 0x1cb   : > { %4910 = vmatpush3.msra.mxu1 %v630_v25  ;;  %4911 = vmatprep.mubr.msk.f32.mxu1 %vm6106_vm0, %v6107_v1  ;;  %v1385_v25 = vld [vmem:[#allocation13 + $0x48] sm:$0xff] }
 0x1cc   : > { %5424 = vmatprep.subr.bf16.mxu1 %v6105_v0  ;;  %v6638_v26 = vpack.c.bf16 %v1385_v25, %v1384_v23  ;;  %v6680_v23 = vld [vmem:[%s7054_s7 + $0x5] ss:$0 sm:$0xff] }
 0x1ce   : > { %4912 = vmatmul.mubr.msk.f32.vlgmr.msra.gmra.mrb[4].mxu1 %vm633_vm2, %v6552_v29 }
 0x1cf   : > { %5426 = vmatpush3.bf16.msra.mxu1 %v6554_v30  ;;  %4933 = vmatprep.mubr.msk.f32.mxu1 %vm6106_vm0, %v6107_v1 }
 0x1d0   : > { %5427 = vmatprep.subr.bf16.mxu1 %v6105_v0 }
 0x1d3   : > { %5429 = vmatpush3.bf16.msra.mxu1 %v6560_v33 }
 0x1d4   : > { %5436 = vmatprep.subr.bf16.mxu1 %v6105_v0 }
 0x29d   : > { %v703_v44 = vpop.f32.mrb[2].mxu1 }
 0x29e   : > { %v4908_v45 = vpop.f32.mrb[3].mxu1  ;;  %4934 = vmatmul.mubr.msk.f32.vlgmr.msra.gmra.mrb[6].mxu1 %vm485_vm1, %v703_v44 }
 0x29f   : > { %5438 = vmatpush3.bf16.msra.mxu1 %v6571_v39  ;;  %4955 = vmatprep.mubr.msk.f32.mxu1 %vm6106_vm0, %v6107_v1 }
 0x2a0   : > { %5439 = vmatprep.subr.bf16.mxu1 %v6105_v0 }
 0x2a1   : > { %v776_v52 = vpop.f32.mrb[4].mxu1 }
 0x2a2   : > { %v4913_v53 = vpop.f32.mrb[5].mxu1  ;;  %4923 = vmatmul.mubr.msk.f32.vlgmr.msra.gmra.mrb[2].mxu0 %vm485_vm1, %v776_v52 }
 0x2a3   : > { %5432 = vmatpush3.bf16.msra.mxu0 %v6575_v46  ;;  %5441 = vmatpush3.bf16.msra.mxu1 %v6577_v47 }
 0x2a4   : > { %5433 = vmatprep.subr.bf16.mxu0 %v6105_v0  ;;  %5448 = vmatprep.subr.bf16.mxu1 %v6105_v0 }
 0x2a5   : > { %4944 = vmatprep.mubr.msk.f32.mxu0 %vm6106_vm0, %v6107_v1 }
 0x2a6   : > { %4956 = vmatmul.mubr.msk.f32.vlgmr.msra.gmra.mrb[8].mxu1 %vm485_vm1, %v703_v44 }
 0x2a7   : > { %5435 = vmatpush3.bf16.msra.mxu0 %v6585_v54  ;;  %5450 = vmatpush3.bf16.msra.mxu1 %v6587_v55 }
 0x2a8   : > { %5442 = vmatprep.subr.bf16.mxu0 %v6105_v0  ;;  %5451 = vmatprep.subr.bf16.mxu1 %v6105_v0 }
 0x2a9   : > { %4977 = vmatprep.mubr.msk.f32.mxu1 %vm6106_vm0, %v6107_v1 }
 0x2aa   : > { %4945 = vmatmul.mubr.msk.f32.vlgmr.msra.gmra.mrb[4].mxu0 %vm485_vm1, %v776_v52 }
 0x2ab   : > { %5444 = vmatpush3.bf16.msra.mxu0 %v6596_v60  ;;  %5453 = vmatpush3.bf16.msra.mxu1 %v6598_v61 }
 0x2ac   : > { %5445 = vmatprep.subr.bf16.mxu0 %v6105_v0  ;;  %5460 = vmatprep.subr.bf16.mxu1 %v6105_v0 }
 0x2ad   : > { %4966 = vmatprep.mubr.msk.f32.mxu0 %vm6106_vm0, %v6107_v1 }
 0x2ae   : > { %4978 = vmatmul.mubr.msk.f32.vlgmr.msra.gmra.mrb[10].mxu1 %vm485_vm1, %v703_v44 }
 0x2af   : > { %5447 = vmatpush3.bf16.msra.mxu0 %v6607_v4  ;;  %5462 = vmatpush3.bf16.msra.mxu1 %v6609_v6 }
 0x2b0   : > { %5454 = vmatprep.subr.bf16.mxu0 %v6105_v0  ;;  %5463 = vmatprep.subr.bf16.mxu1 %v6105_v0 }
 0x2b1   : > { %4999 = vmatprep.mubr.msk.f32.mxu1 %vm6106_vm0, %v6107_v1 }
 0x2b2   : > { %4967 = vmatmul.mubr.msk.f32.vlgmr.msra.gmra.mrb[6].mxu0 %vm485_vm1, %v776_v52 }
 0x2b3   : > { %5456 = vmatpush3.bf16.msra.mxu0 %v6618_v15  ;;  %5465 = vmatpush3.bf16.msra.mxu1 %v6620_v16 }
 0x2b4   : > { %5457 = vmatprep.subr.bf16.mxu0 %v6105_v0  ;;  %4988 = vmatprep.mubr.msk.f32.mxu0 %vm6106_vm0, %v6107_v1 }
 0x2b5   : > { %5472 = vmatprep.subr.bf16.mxu1 %v6105_v0 }
 0x2b6   : > { %5000 = vmatmul.mubr.msk.f32.vlgmr.msra.gmra.mrb[12].mxu1 %vm485_vm1, %v6512_v14 }
 0x2b7   : > { %5459 = vmatpush3.bf16.msra.mxu0 %v6629_v22  ;;  %5474 = vmatpush3.bf16.msra.mxu1 %v6497_v5 }
 0x2b8   : > { %5466 = vmatprep.subr.bf16.mxu0 %v6105_v0  ;;  %5475 = vmatprep.subr.bf16.mxu1 %v6105_v0 }
 0x2b9   : > { %5021 = vmatprep.mubr.msk.f32.mxu1 %vm6106_vm0, %v6107_v1 }
 0x2ba   : > { %4989 = vmatmul.mubr.msk.f32.vlgmr.msra.gmra.mrb[8].mxu0 %vm485_vm1, %v6512_v14 }
 0x2bb   : > { %5468 = vmatpush3.bf16.msra.mxu0 %v6638_v26  ;;  %5010 = vmatprep.mubr.msk.f32.mxu0 %vm6106_vm0, %v6107_v1 }
 0x2bc   : > { %5469 = vmatprep.subr.bf16.mxu0 %v6105_v0  ;;  %5477 = vmatpush3.bf16.msra.mxu1 %v6502_v12 }
 0x2bd   : > { %5035 = vmatprep.subr.mxu1 %v6107_v1 }
 0x2bf   : > { %5471 = vmatpush3.bf16.msra.mxu0 %v6648_v31 }
 0x2c0   : > { %5478 = vmatprep.subr.bf16.mxu0 %v6105_v0 }
 0x2c2   : > { %5011 = vmatmul.mubr.msk.f32.vlgmr.msra.gmra.mrb[10].mxu0 %vm485_vm1, %v6512_v14 }
 0x2c3   : > { %5480 = vmatpush3.bf16.msra.mxu0 %v6499_v9  ;;  %5032 = vmatprep.mubr.msk.f32.mxu0 %vm6106_vm0, %v6107_v1 }
 0x2c4   : > { %5481 = vmatprep.subr.bf16.mxu0 %v6105_v0 }
 0x2c7   : > { %5483 = vmatpush3.bf16.msra.mxu0 %v6506_v13 }
 0x2c8   : > { %5484 = vmatprep.subr.bf16.mxu0 %v6105_v0 }
 0x371   : > { %v930_v32 = vpop.f32.mrb[6].mxu1 }
 0x372   : > { %v4935_v34 = vpop.f32.mrb[7].mxu1 }
 0x375   : > { %v857_v35 = vpop.f32.mrb[2].mxu0 }
 0x376   : > { %v931_v37 = vadd.f32 %v930_v32, %v857_v35  ;;  %v4924_v38 = vpop.f32.mrb[3].mxu0 }
 0x379   : > { %v1080_v40 = vpop.f32.mrb[8].mxu1 }
 0x37a   : > { %v4957_v41 = vpop.f32.mrb[9].mxu1 }
 0x37d   : > { %v1010_v42 = vpop.f32.mrb[4].mxu0 }
 0x37e   : > { %v1081_v43 = vadd.f32 %v1080_v40, %v1010_v42  ;;  %v4946_v44 = vpop.f32.mrb[5].mxu0 }
 0x381   : > { %v1230_v45 = vpop.f32.mrb[10].mxu1 }
 0x382   : > { %v4979_v48 = vpop.f32.mrb[11].mxu1 }
 0x385   : > { %v1160_v49 = vpop.f32.mrb[6].mxu0 }
 0x386   : > { %v1231_v50 = vadd.f32 %v1230_v45, %v1160_v49  ;;  %v4968_v51 = vpop.f32.mrb[7].mxu0 }
 0x388   : > { %v1416_v34 = vadd.f32 %v6686_v27, %v1231_v50 }
 0x389   : > { %v1379_v52 = vpop.f32.mrb[12].mxu1 }
 0x38a   : > { %v1400_v53 = vadd.f32 %v1379_v52, %v1081_v43  ;;  %v5001_v56 = vpop.f32.mrb[13].mxu1 }
 0x38b   : > { %v6774_v56 = vld [vmem:[%s400_s25 + $0x8] sm:$0xff]  ;;  %s6016_s25 = scalar_lea.vmem %s7001_s16, 256 }
 0x38c   : > { %v1405_v10 = vadd.f32 %v6674_v3, %v1400_v53  ;;  %p6017_p5 = scmp.ne.s32.totalorder %s7001_s16, %s6016_s25  ;;  %p6024_p7 = scmp.lt.s32.totalorder %s6022_s26, %s6016_s25 }
 0x38d   : > { %v1304_v58 = vpop.f32.mrb[8].mxu0 }
 0x38e   : > { %v1388_v59 = vadd.f32 %v1304_v58, %v931_v37  ;;  %v4990_v62 = vpop.f32.mrb[9].mxu0  ;;  %v4584_v11 = vmul.f32 -1.442695, %v1405_v10  ;;  %p6018_p4 = pnand %p6017_p5, %p7118_p2  ;;  %p6025_p9 = por %p6024_p7, %p6023_p13 }
 0x390   : > { %v1393_v63 = vadd.f32 %v6668_v57, %v1388_v59  ;;  %p6019_p11 = pneg %p6018_p4 }
 0x392   : > { %v4582_v2 = vmul.f32 -1.442695, %v1393_v63  ;;  %p6026_p12 = pnand %p6025_p9, %p6019_p11 }
 0x394   : > { %5774 = vpow2.f32 %v4582_v2 }
 0x395   : > { %v1487_v7 = vpop.f32.mrb[10].mxu0  ;;  %5776 = vpow2.f32 %v4584_v11 }
 0x396   : > { %v5012_v8 = vpop.f32.mrb[11].mxu0  ;;  %v1488_v25 = vadd.f32 %v6680_v23, %v1487_v7 }
 0x39e   : > { %v5775_v20 = vpop.eup %5774 }
 0x39f   : > { %v1397_v21 = vadd.f32 1.0, %v5775_v20  ;;  %v5777_v28 = vpop.eup %5776 }
 0x3a0   : > { %v1409_v37 = vadd.f32 1.0, %v5777_v28 }
 0x3a1   : > { %5778 = vrcp.f32 %v1397_v21 }
 0x3ab   : > { %v5779_v32 = vpop.eup %5778 }
 0x3ac   : > { %v1491_v35 = vmul.f32 %v5779_v32, %v1488_v25 }
 0x3ae   : > { %v1492_v38 = vadd.f32 %v1491_v35, %v1416_v34 }
 0x3b0   : > { %5780 = vtanh.f32 %v1492_v38 }
 0x3b1   : > { %5782 = vrcp.f32 %v1409_v37 }
 0x3ba   : > { %v5781_v40 = vpop.eup %5780 }
 0x3bb   : > { %v1494_v41 = vsub.f32 %v6512_v14, %v5781_v40  ;;  %v5783_v42 = vpop.eup %5782 }
 0x3bd   : > { %v1495_v43 = vmul.f32 %v5783_v42, %v1494_v41 }
 0x3bf   : > { %v6690_v44 = vadd.f32 %v5781_v40, %v1495_v43 }
 0x3c1   : > { %5022 = vmatmul.mubr.msk.f32.vlgmr.msra.gmra.mrb[14].mxu1 %vm485_vm1, %v6690_v44  ;;  %5033 = vmatmul.mubr.msk.f32.vlgmr.msra.gmra.mrb[12].mxu0 %vm485_vm1, %v6690_v44 }
 0x3c2   : > { %5037 = vmatprep.mubr.msk.f32.mxu1 %vm6106_vm0, %v6107_v1  ;;  %5486 = vmatpush3.bf16.msra.mxu0 %v6525_v17 }
 0x3c3   : > { %5487 = vmatprep.subr.bf16.mxu0 %v6105_v0  ;;  %5053 = vmatprep.mubr.msk.f32.mxu0 %vm6106_vm0, %v6107_v1 }
 0x3c6   : > { %5489 = vmatpush3.bf16.msra.mxu0 %v6567_v36 }
 0x3c7   : > { %5496 = vmatprep.subr.bf16.mxu0 %v6105_v0 }
 0x494   : > { %v1566_v14 = vpop.f32.mrb[14].mxu1  ;;  %v1636_v45 = vpop.f32.mrb[12].mxu0 }
 0x495   : > { %v1567_v48 = vadd.f32 %v6532_v18, %v1566_v14  ;;  %v5023_v49 = vpop.f32.mrb[15].mxu1  ;;  %v5034_v50 = vpop.f32.mrb[13].mxu0  ;;  %v1637_v51 = vadd.f32 %v6537_v19, %v1636_v45 }
 0x496   : > { %v6806_v49 = vld [vmem:[%s382_s22 + $0x8] sm:$0xff] }
 0x497   : > { %5036 = vmatpush3.msra.mxu1 %v1567_v48 }
 0x498   : > { %5038 = vmatmul.mubr.msk.f32.vlgmr.msra.gmra.mrb[16].mxu1 %vm633_vm2, %v6542_v24  ;;  %5040 = vmatprep.subr.mxu1 %v6107_v1 }
 0x499   : > { %5041 = vmatpush3.msra.mxu1 %v1637_v51  ;;  %5042 = vmatprep.mubr.msk.f32.mxu1 %vm6106_vm0, %v6107_v1 }
 0x49a   : > { %5490 = vmatprep.subr.bf16.mxu1 %v6105_v0 }
 0x49c   : > { %5043 = vmatmul.mubr.msk.f32.vlgmr.msra.gmra.mrb[18].mxu1 %vm633_vm2, %v6552_v29 }
 0x49d   : > { %5492 = vmatpush3.bf16.msra.mxu1 %v6554_v30  ;;  %5064 = vmatprep.mubr.msk.f32.mxu1 %vm6106_vm0, %v6107_v1 }
 0x49e   : > { %5493 = vmatprep.subr.bf16.mxu1 %v6105_v0 }
 0x4a1   : > { %5495 = vmatpush3.bf16.msra.mxu1 %v6560_v33 }
 0x4a2   : > { %5502 = vmatprep.subr.bf16.mxu1 %v6105_v0 }
 0x56b   : > { %v1706_v24 = vpop.f32.mrb[16].mxu1 }
 0x56c   : > { %v5039_v52 = vpop.f32.mrb[17].mxu1  ;;  %5065 = vmatmul.mubr.msk.f32.vlgmr.msra.gmra.mrb[20].mxu1 %vm485_vm1, %v1706_v24 }
 0x56d   : > { %5504 = vmatpush3.bf16.msra.mxu1 %v6571_v39  ;;  %5086 = vmatprep.mubr.msk.f32.mxu1 %vm6106_vm0, %v6107_v1 }
 0x56e   : > { %5505 = vmatprep.subr.bf16.mxu1 %v6105_v0 }
 0x56f   : > { %v1776_v29 = vpop.f32.mrb[18].mxu1 }
 0x570   : > { %v5044_v53 = vpop.f32.mrb[19].mxu1  ;;  %5054 = vmatmul.mubr.msk.f32.vlgmr.msra.gmra.mrb[14].mxu0 %vm485_vm1, %v1776_v29 }
 0x571   : > { %5498 = vmatpush3.bf16.msra.mxu0 %v6575_v46  ;;  %5507 = vmatpush3.bf16.msra.mxu1 %v6577_v47 }
 0x572   : > { %5499 = vmatprep.subr.bf16.mxu0 %v6105_v0  ;;  %5514 = vmatprep.subr.bf16.mxu1 %v6105_v0 }
 0x573   : > { %5075 = vmatprep.mubr.msk.f32.mxu0 %vm6106_vm0, %v6107_v1 }
 0x574   : > { %5087 = vmatmul.mubr.msk.f32.vlgmr.msra.gmra.mrb[22].mxu1 %vm485_vm1, %v1706_v24 }
 0x575   : > { %5501 = vmatpush3.bf16.msra.mxu0 %v6585_v54  ;;  %5516 = vmatpush3.bf16.msra.mxu1 %v6587_v55 }
 0x576   : > { %5508 = vmatprep.subr.bf16.mxu0 %v6105_v0  ;;  %5517 = vmatprep.subr.bf16.mxu1 %v6105_v0 }
 0x577   : > { %5108 = vmatprep.mubr.msk.f32.mxu1 %vm6106_vm0, %v6107_v1 }
 0x578   : > { %5076 = vmatmul.mubr.msk.f32.vlgmr.msra.gmra.mrb[16].mxu0 %vm485_vm1, %v1776_v29 }
 0x579   : > { %5510 = vmatpush3.bf16.msra.mxu0 %v6596_v60  ;;  %5519 = vmatpush3.bf16.msra.mxu1 %v6598_v61 }
 0x57a   : > { %5511 = vmatprep.subr.bf16.mxu0 %v6105_v0  ;;  %5526 = vmatprep.subr.bf16.mxu1 %v6105_v0 }
 0x57b   : > { %5097 = vmatprep.mubr.msk.f32.mxu0 %vm6106_vm0, %v6107_v1 }
 0x57c   : > { %5109 = vmatmul.mubr.msk.f32.vlgmr.msra.gmra.mrb[24].mxu1 %vm485_vm1, %v1706_v24 }
 0x57d   : > { %5513 = vmatpush3.bf16.msra.mxu0 %v6607_v4  ;;  %5528 = vmatpush3.bf16.msra.mxu1 %v6609_v6 }
 0x57e   : > { %5520 = vmatprep.subr.bf16.mxu0 %v6105_v0  ;;  %5529 = vmatprep.subr.bf16.mxu1 %v6105_v0 }
 0x57f   : > { %5130 = vmatprep.mubr.msk.f32.mxu1 %vm6106_vm0, %v6107_v1 }
 0x580   : > { %5098 = vmatmul.mubr.msk.f32.vlgmr.msra.gmra.mrb[18].mxu0 %vm485_vm1, %v1776_v29 }
 0x581   : > { %5522 = vmatpush3.bf16.msra.mxu0 %v6618_v15  ;;  %5531 = vmatpush3.bf16.msra.mxu1 %v6620_v16 }
 0x582   : > { %5523 = vmatprep.subr.bf16.mxu0 %v6105_v0  ;;  %5538 = vmatprep.subr.bf16.mxu1 %v6105_v0 }
 0x583   : > { %5119 = vmatprep.mubr.msk.f32.mxu0 %vm6106_vm0, %v6107_v1 }
 0x584   : > { %5131 = vmatmul.mubr.msk.f32.vlgmr.msra.gmra.mrb[26].mxu1 %vm485_vm1, %v6690_v44 }
 0x585   : > { %5525 = vmatpush3.bf16.msra.mxu0 %v6629_v22  ;;  %5540 = vmatpush3.bf16.msra.mxu1 %v6497_v5 }
 0x586   : > { %5532 = vmatprep.subr.bf16.mxu0 %v6105_v0  ;;  %5541 = vmatprep.subr.bf16.mxu1 %v6105_v0 }
 0x587   : > { %5152 = vmatprep.mubr.msk.f32.mxu1 %vm6106_vm0, %v6107_v1 }
 0x588   : > { %5120 = vmatmul.mubr.msk.f32.vlgmr.msra.gmra.mrb[20].mxu0 %vm485_vm1, %v6690_v44 }
 0x589   : > { %5534 = vmatpush3.bf16.msra.mxu0 %v6638_v26  ;;  %5543 = vmatpush3.bf16.msra.mxu1 %v6502_v12 }
 0x58a   : > { %5535 = vmatprep.subr.bf16.mxu0 %v6105_v0  ;;  %5141 = vmatprep.mubr.msk.f32.mxu0 %vm6106_vm0, %v6107_v1 }
 0x58b   : > { %5166 = vmatprep.subr.mxu1 %v6107_v1 }
 0x58c   : > { %5153 = vmatmul.mubr.msk.f32.vlgmr.msra.gmra.mrb[28].mxu1 %vm485_vm1, %v6774_v56 }
 0x58d   : > { %5537 = vmatpush3.bf16.msra.mxu0 %v6648_v31  ;;  %5168 = vmatprep.mubr.msk.f32.mxu1 %vm6106_vm0, %v6107_v1 }
 0x58e   : > { %5544 = vmatprep.subr.bf16.mxu0 %v6105_v0 }
 0x590   : > { %5142 = vmatmul.mubr.msk.f32.vlgmr.msra.gmra.mrb[22].mxu0 %vm485_vm1, %v6690_v44 }
 0x591   : > { %5546 = vmatpush3.bf16.msra.mxu0 %v6499_v9  ;;  %5163 = vmatprep.mubr.msk.f32.mxu0 %vm6106_vm0, %v6107_v1 }
 0x592   : > { %5547 = vmatprep.subr.bf16.mxu0 %v6105_v0 }
 0x595   : > { %5549 = vmatpush3.bf16.msra.mxu0 %v6506_v13 }
 0x596   : > { %5550 = vmatprep.subr.bf16.mxu0 %v6105_v0 }
 0x598   : > { %5164 = vmatmul.mubr.msk.f32.vlgmr.msra.gmra.mrb[24].mxu0 %vm485_vm1, %v6774_v56 }
 0x599   : > { %5552 = vmatpush3.bf16.msra.mxu0 %v6525_v17  ;;  %5184 = vmatprep.mubr.msk.f32.mxu0 %vm6106_vm0, %v6107_v1 }
 0x59a   : > { %5553 = vmatprep.subr.bf16.mxu0 %v6105_v0 }
 0x59d   : > { %5555 = vmatpush3.bf16.msra.mxu0 %v6567_v36 }
 0x59e   : > { %5562 = vmatprep.subr.bf16.mxu0 %v6105_v0 }
 0x63f   : > { %v1922_v58 = vpop.f32.mrb[20].mxu1 }
 0x640   : > { %v5066_v59 = vpop.f32.mrb[21].mxu1 }
 0x643   : > { %v1849_v62 = vpop.f32.mrb[14].mxu0 }
 0x644   : > { %v1923_v63 = vadd.f32 %v1922_v58, %v1849_v62  ;;  %v5055_v2 = vpop.f32.mrb[15].mxu0 }
 0x647   : > { %v2062_v7 = vpop.f32.mrb[22].mxu1 }
 0x648   : > { %v5088_v8 = vpop.f32.mrb[23].mxu1 }
 0x64b   : > { %v1992_v10 = vpop.f32.mrb[16].mxu0 }
 0x64c   : > { %v2063_v11 = vadd.f32 %v2062_v7, %v1992_v10  ;;  %v5077_v20 = vpop.f32.mrb[17].mxu0 }
 0x64f   : > { %v2202_v21 = vpop.f32.mrb[24].mxu1 }
 0x650   : > { %v5110_v25 = vpop.f32.mrb[25].mxu1 }
 0x653   : > { %v2132_v28 = vpop.f32.mrb[18].mxu0 }
 0x654   : > { %v2203_v32 = vadd.f32 %v2202_v21, %v2132_v28  ;;  %v5099_v34 = vpop.f32.mrb[19].mxu0 }
 0x657   : > { %v2342_v35 = vpop.f32.mrb[26].mxu1 }
 0x658   : > { %v2354_v37 = vadd.f32 %v2342_v35, %v2063_v11  ;;  %v5132_v38 = vpop.f32.mrb[27].mxu1  ;;  %v2362_v11 = vadd.f32 %v6686_v27, %v2203_v32 }
 0x65a   : > { %v2355_v52 = vadd.f32 %v6674_v3, %v2354_v37 }
 0x65b   : > { %v2272_v40 = vpop.f32.mrb[20].mxu0 }
 0x65c   : > { %v2346_v41 = vadd.f32 %v2272_v40, %v1923_v63  ;;  %v5121_v42 = vpop.f32.mrb[21].mxu0  ;;  %v4601_v29 = vmul.f32 -1.442695, %v2355_v52  ;;  %v6817_v63 = vld [vmem:[%s391_s20 + $0x8] sm:$0xff]  ;;  %s4375_s20 = scalar_lea.sflag [#allocation4], %s6465_s19 }
 0x65e   : > { %v2347_v43 = vadd.f32 %v6668_v57, %v2346_v41 }
 0x65f   : > { %v2515_v14 = vpop.f32.mrb[28].mxu1 }
 0x660   : > { %v4600_v45 = vmul.f32 -1.442695, %v2347_v43  ;;  %v2516_v48 = vadd.f32 %v6532_v18, %v2515_v14  ;;  %v5154_v50 = vpop.f32.mrb[29].mxu1 }
 0x662   : > { %5784 = vpow2.f32 %v4600_v45  ;;  %5167 = vmatpush3.msra.mxu1 %v2516_v48 }
 0x663   : > { %v2429_v51 = vpop.f32.mrb[22].mxu0  ;;  %5169 = vmatmul.mubr.msk.f32.vlgmr.msra.gmra.mrb[30].mxu1 %vm633_vm2, %v6806_v49  ;;  %5171 = vmatprep.subr.mxu1 %v6107_v1  ;;  %5786 = vpow2.f32 %v4601_v29 }
 0x664   : > { %v5143_v24 = vpop.f32.mrb[23].mxu0  ;;  %5173 = vmatprep.mubr.msk.f32.mxu1 %vm6106_vm0, %v6107_v1  ;;  %v2430_v8 = vadd.f32 %v6680_v23, %v2429_v51 }
 0x66b   : > { %v2585_v53 = vpop.f32.mrb[24].mxu0 }
 0x66c   : > { %v5785_v58 = vpop.eup %5784  ;;  %v2586_v59 = vadd.f32 %v6537_v19, %v2585_v53  ;;  %v5165_v62 = vpop.f32.mrb[25].mxu0 }
 0x66d   : > { %v2351_v2 = vadd.f32 1.0, %v5785_v58  ;;  %v5787_v7 = vpop.eup %5786 }
 0x66e   : > { %5172 = vmatpush3.msra.mxu1 %v2586_v59  ;;  %v2359_v21 = vadd.f32 1.0, %v5787_v7 }
 0x66f   : > { %5788 = vrcp.f32 %v2351_v2  ;;  %5174 = vmatmul.mubr.msk.f32.vlgmr.msra.gmra.mrb[32].mxu1 %vm633_vm2, %v6817_v63  ;;  %5556 = vmatprep.subr.bf16.mxu1 %v6105_v0 }
 0x670   : > { %5558 = vmatpush3.bf16.msra.mxu1 %v6554_v30  ;;  %5195 = vmatprep.mubr.msk.f32.mxu1 %vm6106_vm0, %v6107_v1 }
 0x671   : > { %5559 = vmatprep.subr.bf16.mxu1 %v6105_v0 }
 0x674   : > { %5561 = vmatpush3.bf16.msra.mxu1 %v6560_v33 }
 0x675   : > { %5568 = vmatprep.subr.bf16.mxu1 %v6105_v0 }
 0x679   : > { %v5789_v10 = vpop.eup %5788 }
 0x67a   : > { %v2433_v20 = vmul.f32 %v5789_v10, %v2430_v8 }
 0x67c   : > { %v2434_v25 = vadd.f32 %v2433_v20, %v2362_v11 }
 0x67e   : > { %5790 = vtanh.f32 %v2434_v25 }
 0x67f   : > { %5792 = vrcp.f32 %v2359_v21 }
 0x688   : > { %v5791_v28 = vpop.eup %5790 }
 0x689   : > { %v2436_v34 = vsub.f32 %v6690_v44, %v5791_v28  ;;  %v5793_v35 = vpop.eup %5792 }
 0x68b   : > { %v2437_v37 = vmul.f32 %v5793_v35, %v2436_v34 }
 0x68d   : > { %v2438_v38 = vadd.f32 %v5791_v28, %v2437_v37 }
 0x68f   : > { %2439 = vst.msk [vmem:[%s6832_s1] sm:$0xff] %vm485_vm1, %v2438_v38 }
 0x736   : > { %v2658_v40 = vpop.f32.mrb[30].mxu1 }
 0x737   : > { %5196 = vmatmul.mubr.msk.f32.vlgmr.msra.gmra.mrb[34].mxu1 %vm485_vm1, %v2658_v40  ;;  %v5170_v32 = vpop.f32.mrb[31].mxu1 }
 0x738   : > { %5570 = vmatpush3.bf16.msra.mxu1 %v6571_v39  ;;  %5217 = vmatprep.mubr.msk.f32.mxu1 %vm6106_vm0, %v6107_v1 }
 0x739   : > { %5571 = vmatprep.subr.bf16.mxu1 %v6105_v0 }
 0x73c   : > { %5573 = vmatpush3.bf16.msra.mxu1 %v6577_v47 }
 0x73d   : > { %5580 = vmatprep.subr.bf16.mxu1 %v6105_v0 }
 0x73f   : > { %5218 = vmatmul.mubr.msk.f32.vlgmr.msra.gmra.mrb[36].mxu1 %vm485_vm1, %v2658_v40 }
 0x740   : > { %5582 = vmatpush3.bf16.msra.mxu1 %v6587_v55  ;;  %5239 = vmatprep.mubr.msk.f32.mxu1 %vm6106_vm0, %v6107_v1 }
 0x741   : > { %5583 = vmatprep.subr.bf16.mxu1 %v6105_v0 }
 0x742   : > { %v2731_v44 = vpop.f32.mrb[32].mxu1 }
 0x743   : > { %v5175_v41 = vpop.f32.mrb[33].mxu1  ;;  %5185 = vmatmul.mubr.msk.f32.vlgmr.msra.gmra.mrb[26].mxu0 %vm485_vm1, %v2731_v44 }
 0x744   : > { %5564 = vmatpush3.bf16.msra.mxu0 %v6575_v46  ;;  %5585 = vmatpush3.bf16.msra.mxu1 %v6598_v61 }
 0x745   : > { %5565 = vmatprep.subr.bf16.mxu0 %v6105_v0  ;;  %5592 = vmatprep.subr.bf16.mxu1 %v6105_v0 }
 0x746   : > { %5206 = vmatprep.mubr.msk.f32.mxu0 %vm6106_vm0, %v6107_v1 }
 0x747   : > { %5240 = vmatmul.mubr.msk.f32.vlgmr.msra.gmra.mrb[38].mxu1 %vm485_vm1, %v2658_v40 }
 0x748   : > { %5567 = vmatpush3.bf16.msra.mxu0 %v6585_v54  ;;  %5594 = vmatpush3.bf16.msra.mxu1 %v6609_v6 }
 0x749   : > { %5574 = vmatprep.subr.bf16.mxu0 %v6105_v0  ;;  %5595 = vmatprep.subr.bf16.mxu1 %v6105_v0 }
 0x74a   : > { %5261 = vmatprep.mubr.msk.f32.mxu1 %vm6106_vm0, %v6107_v1 }
 0x74b   : > { %5207 = vmatmul.mubr.msk.f32.vlgmr.msra.gmra.mrb[28].mxu0 %vm485_vm1, %v2731_v44 }
 0x74c   : > { %5576 = vmatpush3.bf16.msra.mxu0 %v6596_v60  ;;  %5597 = vmatpush3.bf16.msra.mxu1 %v6620_v16 }
 0x74d   : > { %5577 = vmatprep.subr.bf16.mxu0 %v6105_v0  ;;  %5228 = vmatprep.mubr.msk.f32.mxu0 %vm6106_vm0, %v6107_v1 }
 0x74e   : > { %5604 = vmatprep.subr.bf16.mxu1 %v6105_v0 }
 0x74f   : > { %5262 = vmatmul.mubr.msk.f32.vlgmr.msra.gmra.mrb[40].mxu1 %vm485_vm1, %v6774_v56 }
 0x750   : > { %5579 = vmatpush3.bf16.msra.mxu0 %v6607_v4  ;;  %5606 = vmatpush3.bf16.msra.mxu1 %v6497_v5 }
 0x751   : > { %5586 = vmatprep.subr.bf16.mxu0 %v6105_v0  ;;  %5607 = vmatprep.subr.bf16.mxu1 %v6105_v0 }
 0x752   : > { %5283 = vmatprep.mubr.msk.f32.mxu1 %vm6106_vm0, %v6107_v1 }
 0x753   : > { %5229 = vmatmul.mubr.msk.f32.vlgmr.msra.gmra.mrb[30].mxu0 %vm485_vm1, %v2731_v44 }
 0x754   : > { %5588 = vmatpush3.bf16.msra.mxu0 %v6618_v15  ;;  %5250 = vmatprep.mubr.msk.f32.mxu0 %vm6106_vm0, %v6107_v1 }
 0x755   : > { %5589 = vmatprep.subr.bf16.mxu0 %v6105_v0  ;;  %5609 = vmatpush3.bf16.msra.mxu1 %v6502_v12 }
 0x756   : > { %5297 = vmatprep.subr.mxu1 %v6107_v1 }
 0x758   : > { %5591 = vmatpush3.bf16.msra.mxu0 %v6629_v22 }
 0x759   : > { %5598 = vmatprep.subr.bf16.mxu0 %v6105_v0 }
 0x75b   : > { %5251 = vmatmul.mubr.msk.f32.vlgmr.msra.gmra.mrb[32].mxu0 %vm485_vm1, %v6774_v56 }
 0x75c   : > { %5600 = vmatpush3.bf16.msra.mxu0 %v6638_v26  ;;  %5272 = vmatprep.mubr.msk.f32.mxu0 %vm6106_vm0, %v6107_v1 }
 0x75d   : > { %5601 = vmatprep.subr.bf16.mxu0 %v6105_v0 }
 0x760   : > { %5603 = vmatpush3.bf16.msra.mxu0 %v6648_v31 }
 0x761   : > { %5610 = vmatprep.subr.bf16.mxu0 %v6105_v0 }
 0x763   : > { %5273 = vmatmul.mubr.msk.f32.vlgmr.msra.gmra.mrb[34].mxu0 %vm485_vm1, %v6774_v56 }
 0x764   : > { %5612 = vmatpush3.bf16.msra.mxu0 %v6499_v9  ;;  %5294 = vmatprep.mubr.msk.f32.mxu0 %vm6106_vm0, %v6107_v1 }
 0x765   : > { %5613 = vmatprep.subr.bf16.mxu0 %v6105_v0 }
 0x768   : > { %5615 = vmatpush3.bf16.msra.mxu0 %v6506_v13 }
 0x769   : > { %5616 = vmatprep.subr.bf16.mxu0 %v6105_v0 }
 0x80a   : > { %v2885_v5 = vpop.f32.mrb[34].mxu1 }
 0x80b   : > { %v5197_v12 = vpop.f32.mrb[35].mxu1 }
 0x812   : > { %v3033_v42 = vpop.f32.mrb[36].mxu1 }
 0x813   : > { %v5219_v43 = vpop.f32.mrb[37].mxu1 }
 0x816   : > { %v2812_v14 = vpop.f32.mrb[26].mxu0 }
 0x817   : > { %v2886_v45 = vadd.f32 %v2885_v5, %v2812_v14  ;;  %v5186_v48 = vpop.f32.mrb[27].mxu0 }
 0x81a   : > { %v3181_v50 = vpop.f32.mrb[38].mxu1 }
 0x81b   : > { %v5241_v51 = vpop.f32.mrb[39].mxu1 }
 0x81e   : > { %v2963_v24 = vpop.f32.mrb[28].mxu0 }
 0x81f   : > { %v3034_v9 = vadd.f32 %v3033_v42, %v2963_v24  ;;  %v5208_v52 = vpop.f32.mrb[29].mxu0 }
 0x822   : > { %v3329_v29 = vpop.f32.mrb[40].mxu1 }
 0x823   : > { %v3345_v53 = vadd.f32 %v3329_v29, %v3034_v9  ;;  %v5263_v58 = vpop.f32.mrb[41].mxu1 }
 0x825   : > { %v3346_v25 = vadd.f32 %v6674_v3, %v3345_v53 }
 0x826   : > { %v3111_v59 = vpop.f32.mrb[30].mxu0 }
 0x827   : > { %v3182_v62 = vadd.f32 %v3181_v50, %v3111_v59  ;;  %v5230_v13 = vpop.f32.mrb[31].mxu0  ;;  %v4619_v28 = vmul.f32 -1.442695, %v3346_v25 }
 0x829   : > { %v3353_v32 = vadd.f32 %v6686_v27, %v3182_v62 }
 0x82e   : > { %v3255_v2 = vpop.f32.mrb[32].mxu0 }
 0x82f   : > { %v3337_v7 = vadd.f32 %v3255_v2, %v2886_v45  ;;  %v5252_v8 = vpop.f32.mrb[33].mxu0 }
 0x831   : > { %v3338_v10 = vadd.f32 %v6668_v57, %v3337_v7 }
 0x833   : > { %v4618_v11 = vmul.f32 -1.442695, %v3338_v10 }
 0x835   : > { %5794 = vpow2.f32 %v4618_v11 }
 0x836   : > { %v3420_v20 = vpop.f32.mrb[34].mxu0  ;;  %5796 = vpow2.f32 %v4619_v28 }
 0x837   : > { %v5274_v21 = vpop.f32.mrb[35].mxu0  ;;  %v3421_v37 = vadd.f32 %v6680_v23, %v3420_v20 }
 0x83f   : > { %v5795_v34 = vpop.eup %5794 }
 0x840   : > { %v3342_v35 = vadd.f32 1.0, %v5795_v34  ;;  %v5797_v38 = vpop.eup %5796 }
 0x841   : > { %v3350_v41 = vadd.f32 1.0, %v5797_v38 }
 0x842   : > { %5798 = vrcp.f32 %v3342_v35 }
 0x84c   : > { %v5799_v40 = vpop.eup %5798 }
 0x84d   : > { %v3424_v44 = vmul.f32 %v5799_v40, %v3421_v37 }
 0x84f   : > { %v3425_v5 = vadd.f32 %v3424_v44, %v3353_v32 }
 0x851   : > { %5800 = vtanh.f32 %v3425_v5 }
 0x852   : > { %5802 = vrcp.f32 %v3350_v41 }
 0x85b   : > { %v5801_v12 = vpop.eup %5800 }
 0x85c   : > { %v3427_v42 = vsub.f32 %v6774_v56, %v5801_v12  ;;  %v5803_v43 = vpop.eup %5802 }
 0x85e   : > { %v3428_v14 = vmul.f32 %v5803_v43, %v3427_v42 }
 0x860   : > { %v6907_v45 = vadd.f32 %v5801_v12, %v3428_v14 }
 0x862   : > { %5284 = vmatmul.mubr.msk.f32.vlgmr.msra.gmra.mrb[42].mxu1 %vm485_vm1, %v6907_v45  ;;  %5295 = vmatmul.mubr.msk.f32.vlgmr.msra.gmra.mrb[36].mxu0 %vm485_vm1, %v6907_v45 }
 0x863   : > { %5299 = vmatprep.mubr.msk.f32.mxu1 %vm6106_vm0, %v6107_v1  ;;  %5618 = vmatpush3.bf16.msra.mxu0 %v6525_v17 }
 0x864   : > { %5619 = vmatprep.subr.bf16.mxu0 %v6105_v0  ;;  %5315 = vmatprep.mubr.msk.f32.mxu0 %vm6106_vm0, %v6107_v1 }
 0x867   : > { %5621 = vmatpush3.bf16.msra.mxu0 %v6567_v36 }
 0x868   : > { %5628 = vmatprep.subr.bf16.mxu0 %v6105_v0 }
 0x935   : > { %v3499_v56 = vpop.f32.mrb[42].mxu1  ;;  %v3569_v48 = vpop.f32.mrb[36].mxu0 }
 0x936   : > { %v3500_v50 = vadd.f32 %v6532_v18, %v3499_v56  ;;  %v5285_v51 = vpop.f32.mrb[43].mxu1  ;;  %v5296_v24 = vpop.f32.mrb[37].mxu0  ;;  %v3570_v9 = vadd.f32 %v6537_v19, %v3569_v48 }
 0x938   : > { %5298 = vmatpush3.msra.mxu1 %v3500_v50 }
 0x939   : > { %5300 = vmatmul.mubr.msk.f32.vlgmr.msra.gmra.mrb[44].mxu1 %vm633_vm2, %v6806_v49  ;;  %5302 = vmatprep.subr.mxu1 %v6107_v1 }
 0x93a   : > { %5303 = vmatpush3.msra.mxu1 %v3570_v9  ;;  %5304 = vmatprep.mubr.msk.f32.mxu1 %vm6106_vm0, %v6107_v1 }
 0x93b   : > { %5622 = vmatprep.subr.bf16.mxu1 %v6105_v0 }
 0x93d   : > { %5305 = vmatmul.mubr.msk.f32.vlgmr.msra.gmra.mrb[46].mxu1 %vm633_vm2, %v6817_v63 }
 0x93e   : > { %5624 = vmatpush3.bf16.msra.mxu1 %v6554_v30  ;;  %5326 = vmatprep.mubr.msk.f32.mxu1 %vm6106_vm0, %v6107_v1 }
 0x93f   : > { %5625 = vmatprep.subr.bf16.mxu1 %v6105_v0 }
 0x942   : > { %5627 = vmatpush3.bf16.msra.mxu1 %v6560_v33 }
 0x943   : > { %5634 = vmatprep.subr.bf16.mxu1 %v6105_v0 }
 0xa0c   : > { %v3639_v17 = vpop.f32.mrb[44].mxu1 }
 0xa0d   : > { %5327 = vmatmul.mubr.msk.f32.vlgmr.msra.gmra.mrb[48].mxu1 %vm485_vm1, %v3639_v17  ;;  %v5301_v18 = vpop.f32.mrb[45].mxu1 }
 0xa0e   : > { %5636 = vmatpush3.bf16.msra.mxu1 %v6571_v39  ;;  %5348 = vmatprep.mubr.msk.f32.mxu1 %vm6106_vm0, %v6107_v1 }
 0xa0f   : > { %5637 = vmatprep.subr.bf16.mxu1 %v6105_v0 }
 0xa10   : > { %v3709_v19 = vpop.f32.mrb[46].mxu1 }
 0xa11   : > { %5316 = vmatmul.mubr.msk.f32.vlgmr.msra.gmra.mrb[38].mxu0 %vm485_vm1, %v3709_v19  ;;  %v5306_v30 = vpop.f32.mrb[47].mxu1 }
 0xa12   : > { %5630 = vmatpush3.bf16.msra.mxu0 %v6575_v46  ;;  %5639 = vmatpush3.bf16.msra.mxu1 %v6577_v47 }
 0xa13   : > { %5631 = vmatprep.subr.bf16.mxu0 %v6105_v0  ;;  %5646 = vmatprep.subr.bf16.mxu1 %v6105_v0 }
 0xa14   : > { %5337 = vmatprep.mubr.msk.f32.mxu0 %vm6106_vm0, %v6107_v1 }
 0xa15   : > { %5349 = vmatmul.mubr.msk.f32.vlgmr.msra.gmra.mrb[50].mxu1 %vm485_vm1, %v3639_v17 }
 0xa16   : > { %5633 = vmatpush3.bf16.msra.mxu0 %v6585_v54  ;;  %5648 = vmatpush3.bf16.msra.mxu1 %v6587_v55 }
 0xa17   : > { %5640 = vmatprep.subr.bf16.mxu0 %v6105_v0  ;;  %5649 = vmatprep.subr.bf16.mxu1 %v6105_v0 }
 0xa18   : > { %5370 = vmatprep.mubr.msk.f32.mxu1 %vm6106_vm0, %v6107_v1 }
 0xa19   : > { %5338 = vmatmul.mubr.msk.f32.vlgmr.msra.gmra.mrb[40].mxu0 %vm485_vm1, %v3709_v19 }
 0xa1a   : > { %5642 = vmatpush3.bf16.msra.mxu0 %v6596_v60  ;;  %5651 = vmatpush3.bf16.msra.mxu1 %v6598_v61 }
 0xa1b   : > { %5643 = vmatprep.subr.bf16.mxu0 %v6105_v0  ;;  %5658 = vmatprep.subr.bf16.mxu1 %v6105_v0 }
 0xa1c   : > { %5359 = vmatprep.mubr.msk.f32.mxu0 %vm6106_vm0, %v6107_v1 }
 0xa1d   : > { %5371 = vmatmul.mubr.msk.f32.vlgmr.msra.gmra.mrb[52].mxu1 %vm485_vm1, %v3639_v17 }
 0xa1e   : > { %5645 = vmatpush3.bf16.msra.mxu0 %v6607_v4  ;;  %5660 = vmatpush3.bf16.msra.mxu1 %v6609_v6 }
 0xa1f   : > { %5652 = vmatprep.subr.bf16.mxu0 %v6105_v0  ;;  %5661 = vmatprep.subr.bf16.mxu1 %v6105_v0 }
 0xa20   : > { %5392 = vmatprep.mubr.msk.f32.mxu1 %vm6106_vm0, %v6107_v1 }
 0xa21   : > { %5360 = vmatmul.mubr.msk.f32.vlgmr.msra.gmra.mrb[42].mxu0 %vm485_vm1, %v3709_v19 }
 0xa22   : > { %5654 = vmatpush3.bf16.msra.mxu0 %v6618_v15  ;;  %5663 = vmatpush3.bf16.msra.mxu1 %v6620_v16 }
 0xa23   : > { %5655 = vmatprep.subr.bf16.mxu0 %v6105_v0  ;;  %5381 = vmatprep.mubr.msk.f32.mxu0 %vm6106_vm0, %v6107_v1 }
 0xa25   : > { %5393 = vmatmul.mubr.msk.f32.vlgmr.msra.gmra.mrb[54].mxu1 %vm485_vm1, %v6907_v45 }
 0xa26   : > { %5657 = vmatpush3.bf16.msra.mxu0 %v6629_v22 }
 0xa27   : > { %5664 = vmatprep.subr.bf16.mxu0 %v6105_v0 }
 0xa29   : > { %5382 = vmatmul.mubr.msk.f32.vlgmr.msra.gmra.mrb[44].mxu0 %vm485_vm1, %v6907_v45 }
 0xa2a   : > { %5666 = vmatpush3.bf16.msra.mxu0 %v6638_v26  ;;  %5403 = vmatprep.mubr.msk.f32.mxu0 %vm6106_vm0, %v6107_v1 }
 0xa2b   : > { %5667 = vmatprep.subr.bf16.mxu0 %v6105_v0 }
 0xa2e   : > { %5669 = vmatpush3.bf16.msra.mxu0 %v6648_v31 }
 0xa31   : > { %5404 = vmatmul.mubr.msk.f32.vlgmr.msra.gmra.mrb[46].mxu0 %vm485_vm1, %v6907_v45 }
 0xae0   : > { %v3855_v33 = vpop.f32.mrb[48].mxu1 }
 0xae1   : > { %v5328_v36 = vpop.f32.mrb[49].mxu1 }
 0xae4   : > { %v3782_v39 = vpop.f32.mrb[38].mxu0 }
 0xae5   : > { %v3856_v46 = vadd.f32 %v3855_v33, %v3782_v39  ;;  %v5317_v47 = vpop.f32.mrb[39].mxu0 }
 0xae8   : > { %v3995_v54 = vpop.f32.mrb[50].mxu1 }
 0xae9   : > { %v5350_v55 = vpop.f32.mrb[51].mxu1 }
 0xaec   : > { %v3925_v60 = vpop.f32.mrb[40].mxu0 }
 0xaed   : > { %v3996_v61 = vadd.f32 %v3995_v54, %v3925_v60  ;;  %v5339_v4 = vpop.f32.mrb[41].mxu0 }
 0xaf0   : > { %v4135_v6 = vpop.f32.mrb[52].mxu1 }
 0xaf1   : > { %v5372_v15 = vpop.f32.mrb[53].mxu1 }
 0xaf4   : > { %v4065_v1 = vpop.f32.mrb[42].mxu0 }
 0xaf5   : > { %v4136_v16 = vadd.f32 %v4135_v6, %v4065_v1  ;;  %v5361_v0 = vpop.f32.mrb[43].mxu0 }
 0xaf8   : > { %v4275_v22 = vpop.f32.mrb[54].mxu1 }
 0xaf9   : > { %v4287_v26 = vadd.f32 %v4275_v22, %v3996_v61  ;;  %v5394_v31 = vpop.f32.mrb[55].mxu1 }
 0xafb   : > { %v4288_v62 = vadd.f32 %v6674_v3, %v4287_v26 }
 0xafc   : > { %v4205_v49 = vpop.f32.mrb[44].mxu0 }
 0xafd   : > { %v4279_v63 = vadd.f32 %v4205_v49, %v3856_v46  ;;  %v5383_v52 = vpop.f32.mrb[45].mxu0  ;;  %v4634_v13 = vmul.f32 -1.442695, %v4288_v62 }
 0xaff   : > { %v4280_v29 = vadd.f32 %v6668_v57, %v4279_v63  ;;  %v4295_v57 = vadd.f32 %v6686_v27, %v4136_v16 }
 0xb01   : > { %v4633_v53 = vmul.f32 -1.442695, %v4280_v29 }
 0xb03   : > { %5804 = vpow2.f32 %v4633_v53 }
 0xb04   : > { %v4362_v58 = vpop.f32.mrb[46].mxu0  ;;  %5806 = vpow2.f32 %v4634_v13 }
 0xb05   : > { %v5405_v59 = vpop.f32.mrb[47].mxu0  ;;  %v4363_v10 = vadd.f32 %v6680_v23, %v4362_v58 }
 0xb0d   : > { %v5805_v2 = vpop.eup %5804 }
 0xb0e   : > { %v4284_v7 = vadd.f32 1.0, %v5805_v2  ;;  %v5807_v8 = vpop.eup %5806 }
 0xb0f   : > { %v4292_v21 = vadd.f32 1.0, %v5807_v8 }
 0xb10   : > { %5808 = vrcp.f32 %v4284_v7 }
 0xb1a   : > { %v5809_v11 = vpop.eup %5808 }
 0xb1b   : > { %v4366_v20 = vmul.f32 %v5809_v11, %v4363_v10 }
 0xb1d   : > { %v4367_v25 = vadd.f32 %v4366_v20, %v4295_v57 }
 0xb1f   : > { %5810 = vtanh.f32 %v4367_v25 }
 0xb20   : > { %5812 = vrcp.f32 %v4292_v21 }
 0xb29   : > { %v5811_v3 = vpop.eup %5810 }
 0xb2a   : > { %v4369_v28 = vsub.f32 %v6907_v45, %v5811_v3  ;;  %v5813_v34 = vpop.eup %5812 }
 0xb2c   : > { %v4370_v35 = vmul.f32 %v5813_v34, %v4369_v28 }
 0xb2e   : > { %v4371_v23 = vadd.f32 %v5811_v3, %v4370_v35 }
 0xb30   : > { %4636 = vst.msk [vmem:[%s6832_s1 + $0x8] sm:$0xff] %vm485_vm1, %v4371_v23 }
 0xb31   : > { %6029 = shalt.err (!%p6026_p12)
}
 0xb32   : > { %s6030_s21 = scalar_lea.hbm %s6999_s13, 256  ;;  %s6034_s3 = scalar_lea.hbm %s7117_s5, 512 }
 0xb33   : > { %p6031_p8 = scmp.ne.s32.totalorder %s6999_s13, %s6030_s21  ;;  %p6035_p1 = scmp.lt.u32.totalorder %s6999_s13, %s7117_s5 }
 0xb34   : > { %p6036_p6 = scmp.lt.u32.totalorder %s6034_s3, %s6030_s21  ;;  %p6038_p5 = scmp.lt.u32.totalorder %s6030_s21, %s6999_s13 }
 0xb35   : > { %p6032_p10 = pnand %p6031_p8, %p7118_p2 }
 0xb36   : > { %p6037_p3 = por %p6036_p6, %p6035_p1 }
 0xb37   : > { %p6033_p0 = pneg %p6032_p10 }
 0xb38   : > { %p6039_p4 = por %p6038_p5, %p6037_p3 }
 0xb3a   : > { %p6040_p11 = pnand %p6039_p4, %p6033_p0 }
 0xb3c   : > { %6043 = shalt.err (!%p6040_p11)
}
 0xb3d   : > { %s6109_s17 = smov 128   ;;  %s6110_s8 = smov 8  }
 0xb3e   : > { %5692 = dma.vmem_to_hbm [thread:$0]  (%p7118_p2), %s7001_s16, 256, %s6999_s13, %s4375_s20, %s6109_s17, %s6109_s17, %s6110_s8  }
 0xb3f PF: > { %s7119_s10 = sld [smem:[#allocation20_spill]]  ;;  %s7120_s18 = sld [smem:[#allocation22_spill]] }
 0xb40   : > { %s7121_s1 = sld [smem:[#allocation21_spill]] }
 0xb45   : > { %s4403_s27 = sand.u32 1, %s7119_s10   ;;  %p7122_p13 = scmp.ne.s32.totalorder %s7120_s18, 0 }
 0xb46   : > { %p7123_p7 = scmp.ge.s32.totalorder %s7121_s1, 2  ;;  %s4404_s15 = scalar_lea.sflag [#allocation4], %s4403_s27 }
 0xb48   : > { %p5718_p9 = pnand %p7123_p7, %p7122_p13 }
 0xb4a   : > { %6077 = dma.done.wait (!%p5718_p9), %s4404_s15, 256  }
 0xb4b   : > { %6079 = vsyncadd (!%p5718_p9), %s4404_s15, 4294967040  ;;  %s7124_s30 = sld [smem:[#allocation23_spill]]  ;;  %s7125_s22 = sld [smem:[#allocation25_spill]] }
 0xb4c   : > { %s7126_s27 = smov %s6086_s28  ;;  %s7127_s28 = smov %s6090_s29 }
 0xb51   : > { %p26_p12 = scmp.ge.s32.totalorder %s7124_s30, 4   ;;  %s7128_s29 = smov %s7125_s22 }
 0xb53   :  { %28 = sbr.rel (!%p26_p12) target bundleno = 14 (0xe), region = 148 }
 0xb5a   :  { %4409 = vsyncpa [#allocation3], 1 }
 0xb5b   :  { %4411 = vsyncpa [#allocation3 + $0x1], 1 }
 0xb5c   :  { %4412 = vsyncpa [#allocation6], 1 }
 0xb5d   :  { %4414 = vsyncpa [#allocation6 + $0x1], 1 }
 0xb5e   :  { %4415 = vsyncpa [#allocation9], 1 }
 0xb5f   :  { %4416 = vsyncpa [#allocation12], 1 }
 0xb60   :  { %4417 = vsyncpa [#allocation4], 1 }
 0xb61   :  { %4419 = vsyncpa [#allocation4 + $0x1], 1 }

</bundles_post_ra>
